<compile_context>
chip_gen: v7x
topology: tpu7x:2x2x1
jax: 0.10.0
libtpu: 0.0.40
codegen_flags: <defaults>
</compile_context>

<pallas_src>
import jax
import jax.numpy as jnp
from jax.experimental import pallas as pl
from jax.experimental.pallas import tpu as pltpu


# ----------------------------- helpers -----------------------------

def _round_up(x, m):
    return ((x + m - 1) // m) * m


def _pad2(x, rows, cols):
    r, c = x.shape
    return jnp.pad(x, ((0, rows - r), (0, cols - c)))


def _choose_tile(n):
    """Square adj tile (multiple of 128 so it is valid as both sublane and lane extent)."""
    if n >= 4096:
        return 512
    if n >= 1024:
        return 256
    return 128


# ----------------------------- kernels -----------------------------

def _encode_kernel(x_ref, w1_ref, b1_ref, wc_ref, bc_ref, s1_ref):
    # support1 = relu(x @ W1 + b1) @ (W2 @ Wg1) + (b2 @ Wg1)
    # (layer2's Linear(64,32) is fused into gcn1's support matmul: no nonlinearity between them)
    h = jnp.dot(x_ref[...], w1_ref[...], preferred_element_type=jnp.float32) + b1_ref[...]
    h = jnp.maximum(h, 0.0)
    s1_ref[...] = jnp.dot(h, wc_ref[...], preferred_element_type=jnp.float32) + bc_ref[...]


def _gcn1_kernel(adj_ref, s1_ref, bg1_ref, wg2_ref, s2_ref, acc_ref):
    # support2 = relu(adj @ support1 + bg1) @ Wg2, K-tiled over adj columns.
    @pl.when(pl.program_id(1) == 0)
    def _():
        acc_ref[...] = jnp.zeros_like(acc_ref)

    adj = adj_ref[...].astype(jnp.float32)           # bf16 stream -> f32 accumulate
    acc_ref[...] += jnp.dot(adj, s1_ref[...], preferred_element_type=jnp.float32)

    @pl.when(pl.program_id(1) == pl.num_programs(1) - 1)
    def _():
        g1 = jnp.maximum(acc_ref[...] + bg1_ref[...], 0.0)
        s2_ref[...] = jnp.dot(g1, wg2_ref[...], preferred_element_type=jnp.float32)


def _gcn2_kernel(adj_ref, s2_ref, bg2_ref, out_ref, acc_ref):
    # logits = adj @ support2 + bg2, K-tiled over adj columns.
    @pl.when(pl.program_id(1) == 0)
    def _():
        acc_ref[...] = jnp.zeros_like(acc_ref)

    adj = adj_ref[...].astype(jnp.float32)
    acc_ref[...] += jnp.dot(adj, s2_ref[...], preferred_element_type=jnp.float32)

    @pl.when(pl.program_id(1) == pl.num_programs(1) - 1)
    def _():
        out_ref[...] = acc_ref[...] + bg2_ref[...]


# ----------------------------- wrapper -----------------------------

def gcn_net_forward(adjacency, feature, params):
    """Full GcnNet forward: encoder pass + two streamed adj sweeps."""
    n, din = feature.shape
    h1 = params["w_l1"].shape[1]          # 64
    hidden = params["w_g1"].shape[1]
    out_dim = params["w_g2"].shape[1]

    tile = _choose_tile(n)
    n_pad = _round_up(n, tile)
    din_p = _round_up(din, 128)
    h1_p = _round_up(h1, 128)
    hid_p = _round_up(hidden, 128)
    out_p = _round_up(out_dim, 128)

    # adj is the only O(N^2) operand: stream it in bf16, zero-pad rows/cols.
    adj_p = _pad2(adjacency.astype(jnp.bfloat16), n_pad, n_pad)
    x_p = _pad2(feature.astype(jnp.float32), n_pad, din_p)

    # Fuse Linear(64,32) into GraphConvolution(32,hidden).
    wc = params["w_l2"] @ params["w_g1"]                  # (64, hidden)
    bc = params["b_l2"] @ params["w_g1"]                  # (hidden,)

    w1_p = _pad2(params["w_l1"], din_p, h1_p)
    b1_p = _pad2(params["b_l1"].reshape(1, -1), 1, h1_p)
    wc_p = _pad2(wc, h1_p, hid_p)
    bc_p = _pad2(bc.reshape(1, -1), 1, hid_p)
    bg1_p = _pad2(params["b_g1"].reshape(1, -1), 1, hid_p)
    wg2_p = _pad2(params["w_g2"], hid_p, out_p)
    bg2_p = _pad2(params["b_g2"].reshape(1, -1), 1, out_p)

    nt = n_pad // tile
    enc_params = pltpu.CompilerParams(
        dimension_semantics=("parallel",),
        vmem_limit_bytes=48 * 1024 * 1024,
    )
    gcn_params = pltpu.CompilerParams(
        dimension_semantics=("parallel", "arbitrary"),   # rows parallel, K reduction last
        vmem_limit_bytes=48 * 1024 * 1024,
    )

    # --- Pass 1: node-feature encoder + fused gcn1 support (no adj, pure row-parallel). ---
    s1 = pl.pallas_call(
        _encode_kernel,
        out_shape=jax.ShapeDtypeStruct((n_pad, hid_p), jnp.float32),
        grid=(nt,),
        in_specs=[pl.BlockSpec((tile, din_p), lambda i: (i, 0)),
                  pl.BlockSpec((din_p, h1_p), lambda i: (0, 0)),
                  pl.BlockSpec((1, h1_p), lambda i: (0, 0)),
                  pl.BlockSpec((h1_p, hid_p), lambda i: (0, 0)),
                  pl.BlockSpec((1, hid_p), lambda i: (0, 0))],
        out_specs=pl.BlockSpec((tile, hid_p), lambda i: (i, 0)),
        compiler_params=enc_params,
    )(x_p, w1_p, b1_p, wc_p, bc_p)

    # --- Pass 2: adj sweep #1 -> support2 = relu(adj @ s1 + bg1) @ Wg2. ---
    s2 = pl.pallas_call(
        _gcn1_kernel,
        out_shape=jax.ShapeDtypeStruct((n_pad, out_p), jnp.float32),
        grid=(nt, nt),
        in_specs=[pl.BlockSpec((tile, tile), lambda i, k: (i, k)),
                  pl.BlockSpec((tile, hid_p), lambda i, k: (k, 0)),
                  pl.BlockSpec((1, hid_p), lambda i, k: (0, 0)),
                  pl.BlockSpec((hid_p, out_p), lambda i, k: (0, 0))],
        out_specs=pl.BlockSpec((tile, out_p), lambda i, k: (i, 0)),
        scratch_shapes=[pltpu.VMEM((tile, hid_p), jnp.float32)],
        compiler_params=gcn_params,
    )(adj_p, s1, bg1_p, wg2_p)

    # --- Pass 3: adj sweep #2 -> logits = adj @ s2 + bg2. ---
    logits_p = pl.pallas_call(
        _gcn2_kernel,
        out_shape=jax.ShapeDtypeStruct((n_pad, out_p), jnp.float32),
        grid=(nt, nt),
        in_specs=[pl.BlockSpec((tile, tile), lambda i, k: (i, k)),
                  pl.BlockSpec((tile, out_p), lambda i, k: (k, 0)),
                  pl.BlockSpec((1, out_p), lambda i, k: (0, 0))],
        out_specs=pl.BlockSpec((tile, out_p), lambda i, k: (i, 0)),
        scratch_shapes=[pltpu.VMEM((tile, out_p), jnp.float32)],
        compiler_params=gcn_params,
    )(adj_p, s2, bg2_p)

    return logits_p[:n, :out_dim]


# ----------------------------- init + reference -----------------------------

def kaiming_uniform(key, shape):
    # torch.nn.init.kaiming_uniform_ style bound = sqrt(6 / fan_in)
    fan_in = shape[0]
    bound = jnp.sqrt(6.0 / fan_in)
    return jax.random.uniform(key, shape, jnp.float32, -bound, bound)


def linear_init(key, in_dim, out_dim):
    # nn.Linear default init; weight stored transposed as [in, out] so kernel does x @ W.
    kw, kb = jax.random.split(key)
    bound = 1.0 / jnp.sqrt(in_dim)
    w = jax.random.uniform(kw, (in_dim, out_dim), jnp.float32, -bound, bound)
    b = jax.random.uniform(kb, (out_dim,), jnp.float32, -bound, bound)
    return w, b


def init_params(key, input_dim, hidden_dim, output_dim):
    k1, k2, k3, k4 = jax.random.split(key, 4)
    w_l1, b_l1 = linear_init(k1, input_dim, 64)
    w_l2, b_l2 = linear_init(k2, 64, 32)
    w_g1 = kaiming_uniform(k3, (32, hidden_dim))
    b_g1 = jnp.zeros((hidden_dim,), jnp.float32)
    w_g2 = kaiming_uniform(k4, (hidden_dim, output_dim))
    b_g2 = jnp.zeros((output_dim,), jnp.float32)
    return dict(w_l1=w_l1, b_l1=b_l1, w_l2=w_l2, b_l2=b_l2,
                w_g1=w_g1, b_g1=b_g1, w_g2=w_g2, b_g2=b_g2)


def reference_forward(adjacency, feature, params):
    # Mirrors the PyTorch module exactly (un-fused, dense adjacency matmul).
    h = jnp.maximum(feature @ params["w_l1"] + params["b_l1"], 0.0)
    f = h @ params["w_l2"] + params["b_l2"]
    g1 = jnp.maximum(adjacency @ (f @ params["w_g1"]) + params["b_g1"], 0.0)
    return adjacency @ (g1 @ params["w_g2"]) + params["b_g2"]


# ----------------------------- main -----------------------------

if __name__ == "__main__":
    # Full-f32 reference matmuls (avoid default bf16 passes skewing the check).
    jax.config.update("jax_default_matmul_precision", "highest")

    num_nodes, input_dim, hidden_dim, output_dim = 300, 20, 32, 7

    key = jax.random.PRNGKey(0)
    k_adj, k_feat, k_params = jax.random.split(key, 3)

    # Symmetric, row-normalized dense adjacency (stand-in for the sparse adjacency).
    a = (jax.random.uniform(k_adj, (num_nodes, num_nodes)) > 0.9).astype(jnp.float32)
    adjacency = a + a.T + jnp.eye(num_nodes, dtype=jnp.float32)
    adjacency = adjacency / jnp.sum(adjacency, axis=1, keepdims=True)
    # Quantize once to bf16 (the dtype the kernel streams adj in) so the f32 reference
    # sees exactly the same adjacency values as the kernel.
    adjacency = adjacency.astype(jnp.bfloat16).astype(jnp.float32)

    feature = jax.random.normal(k_feat, (num_nodes, input_dim), jnp.float32)
    params = init_params(k_params, input_dim, hidden_dim, output_dim)

    logits = gcn_net_forward(adjacency, feature, params)
    jax.block_until_ready(logits)

    ref = reference_forward(adjacency, feature, params)
    assert logits.shape == (num_nodes, output_dim)
    max_err = float(jnp.max(jnp.abs(logits - ref)))
    assert jnp.allclose(logits, ref, atol=2e-3, rtol=2e-3), max_err

    print("KERNEL_OK")
</pallas_src>

<mosaic_0001>
module attributes {stable_mosaic.version = 11 : i64} {
  func.func @_encode_kernel(%arg0: i32, %arg1: memref<128x128xf32, #tpu.memory_space<vmem>>, %arg2: memref<128x128xf32, #tpu.memory_space<vmem>>, %arg3: memref<1x128xf32, #tpu.memory_space<vmem>>, %arg4: memref<128x128xf32, #tpu.memory_space<vmem>>, %arg5: memref<1x128xf32, #tpu.memory_space<vmem>>, %arg6: memref<128x128xf32, #tpu.memory_space<vmem>>) attributes {dimension_semantics = [#tpu.dimension_semantics<parallel>], iteration_bounds = array<i64: 3>, scalar_prefetch = 0 : i64, scratch_operands = 0 : i64, tpu.core_type = #tpu.core_type<tc>, window_params = [{transform_indices = @transform_0, window_bounds = array<i64: 128, 128>}, {pipeline_mode = #tpu.pipeline_mode<synchronous>, transform_indices = @transform_1, window_bounds = array<i64: 128, 128>}, {pipeline_mode = #tpu.pipeline_mode<synchronous>, transform_indices = @transform_2, window_bounds = array<i64: 1, 128>}, {pipeline_mode = #tpu.pipeline_mode<synchronous>, transform_indices = @transform_3, window_bounds = array<i64: 128, 128>}, {pipeline_mode = #tpu.pipeline_mode<synchronous>, transform_indices = @transform_4, window_bounds = array<i64: 1, 128>}, {transform_indices = @transform_5, window_bounds = array<i64: 128, 128>}]} {
    %c0 = arith.constant 0 : index
    %c0_0 = arith.constant 0 : index
    %0 = vector.load %arg1[%c0, %c0_0] : memref<128x128xf32, #tpu.memory_space<vmem>>, vector<128x128xf32>
    %c0_1 = arith.constant 0 : index
    %c0_2 = arith.constant 0 : index
    %1 = vector.load %arg2[%c0_1, %c0_2] : memref<128x128xf32, #tpu.memory_space<vmem>>, vector<128x128xf32>
    %cst = arith.constant dense<0.000000e+00> : vector<128x128xf32>
    %2 = tpu.matmul %0, %1, %cst {dimension_numbers = #tpu.dot_dimension_numbers<[1], [0], [0], [1], [0, 0, 1, 1], [], []>, precision = #tpu.contract_precision<fp32>} : vector<128x128xf32>, vector<128x128xf32>, vector<128x128xf32> -> vector<128x128xf32>
    %c0_3 = arith.constant 0 : index
    %c0_4 = arith.constant 0 : index
    %3 = vector.load %arg3[%c0_3, %c0_4] : memref<1x128xf32, #tpu.memory_space<vmem>>, vector<1x128xf32>
    %4 = vector.broadcast %3 : vector<1x128xf32> to vector<128x128xf32>
    %5 = arith.addf %2, %4 : vector<128x128xf32>
    %cst_5 = arith.constant 0.000000e+00 : f32
    %6 = vector.broadcast %cst_5 : f32 to vector<128x128xf32>
    %7 = arith.maximumf %5, %6 : vector<128x128xf32>
    %c0_6 = arith.constant 0 : index
    %c0_7 = arith.constant 0 : index
    %8 = vector.load %arg4[%c0_6, %c0_7] : memref<128x128xf32, #tpu.memory_space<vmem>>, vector<128x128xf32>
    %cst_8 = arith.constant dense<0.000000e+00> : vector<128x128xf32>
    %9 = tpu.matmul %7, %8, %cst_8 {dimension_numbers = #tpu.dot_dimension_numbers<[1], [0], [0], [1], [0, 0, 1, 1], [], []>, precision = #tpu.contract_precision<fp32>} : vector<128x128xf32>, vector<128x128xf32>, vector<128x128xf32> -> vector<128x128xf32>
    %c0_9 = arith.constant 0 : index
    %c0_10 = arith.constant 0 : index
    %10 = vector.load %arg5[%c0_9, %c0_10] : memref<1x128xf32, #tpu.memory_space<vmem>>, vector<1x128xf32>
    %11 = vector.broadcast %10 : vector<1x128xf32> to vector<128x128xf32>
    %12 = arith.addf %9, %11 : vector<128x128xf32>
    %c0_11 = arith.constant 0 : index
    %c0_12 = arith.constant 0 : index
    %13 = vector.load %arg6[%c0_11, %c0_12] : memref<128x128xf32, #tpu.memory_space<vmem>>, vector<128x128xf32>
    tpu.vector_store %arg6[%c0_11, %c0_12], %12 {strides = array<i32>} : memref<128x128xf32, #tpu.memory_space<vmem>>, vector<128x128xf32>,
    return
  }
  func.func @transform_0(%arg0: i32) -> (i32, i32) {
    %c0_i32 = arith.constant 0 : i32
    %c0_i32_0 = arith.constant 0 : i32
    return %arg0, %c0_i32 : i32, i32
  }
  func.func @transform_1(%arg0: i32) -> (i32, i32) {
    %c0_i32 = arith.constant 0 : i32
    %c0_i32_0 = arith.constant 0 : i32
    %c0_i32_1 = arith.constant 0 : i32
    return %c0_i32, %c0_i32_0 : i32, i32
  }
  func.func @transform_2(%arg0: i32) -> (i32, i32) {
    %c0_i32 = arith.constant 0 : i32
    %c0_i32_0 = arith.constant 0 : i32
    %c0_i32_1 = arith.constant 0 : i32
    return %c0_i32, %c0_i32_0 : i32, i32
  }
  func.func @transform_3(%arg0: i32) -> (i32, i32) {
    %c0_i32 = arith.constant 0 : i32
    %c0_i32_0 = arith.constant 0 : i32
    %c0_i32_1 = arith.constant 0 : i32
    return %c0_i32, %c0_i32_0 : i32, i32
  }
  func.func @transform_4(%arg0: i32) -> (i32, i32) {
    %c0_i32 = arith.constant 0 : i32
    %c0_i32_0 = arith.constant 0 : i32
    %c0_i32_1 = arith.constant 0 : i32
    return %c0_i32, %c0_i32_0 : i32, i32
  }
  func.func @transform_5(%arg0: i32) -> (i32, i32) {
    %c0_i32 = arith.constant 0 : i32
    %c0_i32_0 = arith.constant 0 : i32
    return %arg0, %c0_i32 : i32, i32
  }
}

</mosaic_0001>

<bundles_post_ra>
// kernel: tpu_custom_call.1
= control target key start
LH: loop header
LB: loop body
LE: loop exit
PB: predicated region body
PF: predicated region fallthrough
CT: control target
= control target key end

     0   :  { %10 = vsyncpa [#allocation3], 0  ;;  %s6393_s0 = inlined_call_operand.hbm [shape: f32[384,128], index: 0, kind: input, shape index: {}]   ;;  %s6394_s1 = inlined_call_operand.hbm [shape: f32[128,128], index: 1, kind: input, shape index: {}]   ;;  %s6395_s2 = inlined_call_operand.vmem [shape: f32[1,128], index: 2, kind: input, shape index: {}]   ;;  %s6396_s3 = inlined_call_operand.hbm [shape: f32[128,128], index: 3, kind: input, shape index: {}]   ;;  %s6397_s4 = inlined_call_operand.vmem [shape: f32[1,128], index: 4, kind: input, shape index: {}]   ;;  %s6398_s5 = inlined_call_operand.hbm [shape: f32[384,128], index: 5, kind: output, shape index: {}]  }
   0x1   :  { %12 = vsyncpa [#allocation3 + $0x1], 0 }
   0x2   :  { %13 = vsyncpa [#allocation6], 0 }
   0x3   :  { %14 = vsyncpa [#allocation4], 0 }
   0x4   :  { %16 = vsyncpa [#allocation4 + $0x1], 0  ;;  %s4967_s18 = smov 0   ;;  %s4969_s19 = smov 0  }
   0x5   :  { %s4971_s20 = smov 0   ;;  %s4973_s21 = smov 0  }
   0x6 LB: > { %s4988_s22 = sadd.s32 4294967295, %s4927_s21   ;;  %s3046_s23 = sadd.s32 4294967294, %s4927_s21   ;;  %s4927_s21 = sphi %s4973_s21, %s6677_s21   ;;  %s4923_s20 = sphi %s4971_s20, %s6676_s20   ;;  %s4919_s19 = sphi %s4969_s19, %s6675_s19   ;;  %s4915_s18 = sphi %s4967_s18, %s6674_s18  }
   0x7   : > { %p42_p0 = scmp.ne.s32.totalorder %s4919_s19, %s4915_s18  ;;  %p6399_p1 = scmp.eq.s32.totalorder %s4988_s22, 0 }
   0x8   : > { %p156_p3 = scmp.eq.s32.totalorder %s3046_s23, 2  ;;  %p3047_p5 = scmp.ge.s32.totalorder %s4927_s21, 1 }
   0x9   : > { %p4997_p4 = por %p6399_p1, %p42_p0  ;;  %p163_p7 = scmp.lt.s32.totalorder %s4927_s21, 4 }
   0xa   : > { %p5002_p6 = por %p156_p3, %p42_p0  ;;  %s4929_s27 = smov [#allocation5]  }
   0xb   : > { %s6514_s24 = scalar_select %p4997_p4, 1, 0 }
   0xc   : > { %s6515_s25 = scalar_select %p5002_p6, 1, 0 }
   0xd   : > { %p5007_p8 = pnand %p3047_p5, %p163_p7  ;;  %s175_s28 = sshll.u32 %s4929_s27, 4  ;;  %s176_s28 = int_to_ptr.vmem [resolvable:$true] %s175_s28 }
   0xe   : > { %s4930_s30 = smov [#allocation7]   ;;  %s4771_s9 = scalar_lea.hbm %s6394_s1, 2048 }
   0xf   : > { %s6516_s26 = scalar_select %p5007_p8, 1, 0 }
  0x10   : > { %p4712_p9 = pneg %p5007_p8  ;;  %s191_s6 = sshll.u32 %s4930_s30, 4  ;;  %s5019_s6 = int_to_ptr.vmem [resolvable:$true] %s191_s6 }
  0x11   : > { %p4772_p11 = scmp.ne.s32.totalorder %s6394_s1, %s4771_s9  ;;  %p4778_p3 = scmp.lt.u32.totalorder %s4771_s9, %s6394_s1 }
  0x12   : > { %p5015_p10 = pnand %p4712_p9, %p6399_p1 }
  0x14   : > { %p4773_p12 = pneg %p5015_p10 }
  0x16   : > { %p4774_p13 = pnand %p4773_p12, %p4772_p11 }
  0x18   : > { %p4775_p0 = pneg %p4774_p13 }
  0x1a   : > { %p4780_p5 = pnand %p4778_p3, %p4775_p0 }
  0x1c   : > { %4783 = shalt.err (!%p4780_p5)
}
  0x1d   : > { %s4784_s14 = scalar_lea.vmem %s176_s28, 2048  ;;  %p4792_p2 = scmp.lt.s32.totalorder %s176_s28, %s176_s28 }
  0x1e   : > { %p4785_p7 = scmp.ne.s32.totalorder %s176_s28, %s4784_s14  ;;  %p4793_p6 = scmp.lt.s32.totalorder %s4784_s14, %s4784_s14 }
  0x20   : > { %p4787_p9 = pnand %p4785_p7, %p4773_p12  ;;  %p4794_p4 = por %p4793_p6, %p4792_p2 }
  0x22   : > { %p4788_p1 = pneg %p4787_p9 }
  0x24   : > { %p4795_p8 = pnand %p4794_p4, %p4788_p1 }
  0x26   : > { %4798 = shalt.err (!%p4795_p8)
}
  0x27   : > { %s4931_s15 = smov 128   ;;  %s4932_s16 = smov 8  }
  0x28   : > { %4715 = dma.hbm_to_vmem [thread:$0]  (!%p5015_p10), %s6394_s1, 2048, %s176_s28, [#allocation6], %s4931_s15, %s4931_s15, %s4932_s16  }
  0x29   : > { %s4799_s7 = scalar_lea.hbm %s6396_s3, 2048 }
  0x2a   : > { %p4800_p1 = scmp.ne.s32.totalorder %s6396_s3, %s4799_s7  ;;  %p4806_p6 = scmp.lt.u32.totalorder %s4799_s7, %s6396_s3 }
  0x2c   : > { %p4802_p2 = pnand %p4800_p1, %p4773_p12 }
  0x2e   : > { %p4803_p4 = pneg %p4802_p2 }
  0x30   : > { %p4808_p8 = pnand %p4806_p6, %p4803_p4 }
  0x32   : > { %4811 = shalt.err (!%p4808_p8)
}
  0x33   : > { %s4812_s28 = scalar_lea.vmem %s5019_s6, 2048  ;;  %p4820_p3 = scmp.lt.s32.totalorder %s5019_s6, %s5019_s6 }
  0x34   : > { %p4813_p11 = scmp.ne.s32.totalorder %s5019_s6, %s4812_s28  ;;  %p4821_p5 = scmp.lt.s32.totalorder %s4812_s28, %s4812_s28 }
  0x36   : > { %p4815_p13 = pnand %p4813_p11, %p4773_p12  ;;  %p4822_p7 = por %p4821_p5, %p4820_p3 }
  0x38   : > { %p4816_p0 = pneg %p4815_p13 }
  0x3a   : > { %p4823_p9 = pnand %p4822_p7, %p4816_p0 }
  0x3c   : > { %4826 = shalt.err (!%p4823_p9)
}
  0x3d   : > { %4718 = dma.hbm_to_vmem [thread:$0]  (!%p5015_p10), %s6396_s3, 2048, %s5019_s6, [#allocation6], %s4931_s15, %s4931_s15, %s4932_s16  }
  0x3e   : > { %s5075_s29 = sadd.s32 1, %s4927_s21   ;;  %s29_s14 = sadd.s32 1, %s4923_s20 }
  0x3f   : > { %s26_s17 = ssub.s32 %s4927_s21, %s5075_s29  ;;  %p36_p12 = scmp.ne.s32.totalorder %s4923_s20, %s4919_s19 }
  0x40   : > { %p27_p1 = scmp.eq.s32.totalorder %s26_s17, 0  ;;  %p37_p2 = scmp.eq.s32.totalorder %s4927_s21, 0 }
  0x41   : > { %p6518_p4 = scmp.eq.s32.totalorder %s4988_s22, 2  ;;  %p4729_p8 = scmp.lt.s32.totalorder %s4927_s21, 3 }
  0x42   : > { %s5091_s27 = scalar_select %p27_p1, %s4923_s20, %s29_s14  }
  0x43   : > { %p5085_p6 = por %p6518_p4, %p36_p12  ;;  %p38_p11 = por %p37_p2, %p36_p12 }
  0x44   : > { %s208_s30 = sand.u32 1, %s4923_s20   ;;  %s3066_s6 = sshll.u32 %s4927_s21, 11 }
  0x45   : > { %s3051_s7 = sshll.u32 %s208_s30, 7  ;;  %s5098_s10 = scalar_lea.hbm %s6393_s0, %s3066_s6 }
  0x46   : > { %s212_s11 = scalar_lea.vmem [#allocation2], %s3051_s7  ;;  %p5102_p10 = pnand %p4729_p8, %p38_p11 }
  0x47   : > { %s219_s28 = sshll.u32 %s212_s11, 4  ;;  %s5106_s13 = scalar_lea.sflag [#allocation3], %s208_s30  ;;  %s5100_s28 = int_to_ptr.vmem [resolvable:$true] %s219_s28 }
  0x48   : > { %s4827_s14 = scalar_lea.hbm %s5098_s10, 2048  ;;  %p4829_p0 = pneg %p5102_p10 }
  0x49   : > { %p4828_p13 = scmp.ne.s32.totalorder %s5098_s10, %s4827_s14  ;;  %s4832_s6 = scalar_lea.hbm %s6393_s0, 6144 }
  0x4a   : > { %p4833_p7 = scmp.lt.u32.totalorder %s5098_s10, %s6393_s0  ;;  %p4834_p9 = scmp.lt.u32.totalorder %s4832_s6, %s4827_s14 }
  0x4b   : > { %p4830_p3 = pnand %p4829_p0, %p4828_p13  ;;  %p4836_p1 = scmp.lt.u32.totalorder %s4827_s14, %s5098_s10 }
  0x4c   : > { %p4835_p12 = por %p4834_p9, %p4833_p7 }
  0x4d   : > { %p4831_p5 = pneg %p4830_p3 }
  0x4e   : > { %p4837_p2 = por %p4836_p1, %p4835_p12 }
  0x50   : > { %p4838_p4 = pnand %p4837_p2, %p4831_p5 }
  0x52   : > { %4841 = shalt.err (!%p4838_p4)
}
  0x53   : > { %s4842_s30 = scalar_lea.vmem %s5100_s28, 2048  ;;  %s4933_s11 = smov [#allocation2]  }
  0x54   : > { %p4843_p8 = scmp.ne.s32.totalorder %s5100_s28, %s4842_s30  ;;  %s4847_s17 = sshll.u32 %s4933_s11, 4  ;;  %s4848_s17 = int_to_ptr.vmem [resolvable:$false] %s4847_s17 }
  0x55   : > { %s4849_s7 = scalar_lea.vmem %s4848_s17, 4096  ;;  %p4850_p3 = scmp.lt.s32.totalorder %s5100_s28, %s4848_s17 }
  0x56   : > { %p4845_p11 = pnand %p4843_p8, %p4829_p0  ;;  %p4851_p7 = scmp.lt.s32.totalorder %s4849_s7, %s4842_s30 }
  0x58   : > { %p4846_p13 = pneg %p4845_p11  ;;  %p4852_p9 = por %p4851_p7, %p4850_p3 }
  0x5a   : > { %p4853_p12 = pnand %p4852_p9, %p4846_p13 }
  0x5c   : > { %4856 = shalt.err (!%p4853_p12)
}
  0x5d   : > { %4722 = dma.hbm_to_vmem [thread:$0]  (!%p5102_p10), %s5098_s10, 2048, %s5100_s28, %s5106_s13, %s4931_s15, %s4931_s15, %s4932_s16  }
  0x5e   : > { %p6521_p0 = scmp.ne.s32.totalorder %s6516_s26, 0 }
  0x60   : > { %231 = sbr.rel (%p6521_p0) target bundleno = 953 (0x3b9), region = 40 }
  0x67   : > { %s5140_s14 = sand.u32 1, %s4919_s19   ;;  %p6522_p5 = scmp.ne.s32.totalorder %s6514_s24, 0 }
  0x68   : > { %s3055_s6 = sshll.u32 %s5140_s14, 7  ;;  %s234_s8 = scalar_lea.sflag [#allocation3], %s5140_s14 }
  0x69   : > { %s5146_s12 = scalar_lea.vmem [#allocation2], %s3055_s6 }
  0x6a   : > { %4902 = dma.done.wait (%p6522_p5), %s234_s8, 2048  }
  0x6b   : > { %4904 = vsyncadd (%p6522_p5), %s234_s8, 4294965248  ;;  %p6523_p10 = scmp.eq.s32.totalorder %s4988_s22, 0 }
  0x6d   : > { %4906 = dma.done.wait (%p6523_p10), [#allocation6], 4096   ;;  %p6524_p1 = pmov %p6523_p10 }
  0x6e   : > { %v290_v0 = vld [vmem:[#allocation5] sm:$0xff]  ;;  %v291_v1 = vld [vmem:[#allocation5 + $0x8] sm:$0xff]  ;;  %v292_v2 = vld [vmem:[#allocation5 + $0x10] sm:$0xff]  ;;  %s6325_s10 = scalar_lea.vmem [#allocation8], %s3055_s6  ;;  %s3067_s28 = sshll.u32 %s4988_s22, 11 }
  0x6f   : > { %4908 = vsyncadd (%p6524_p1), [#allocation6], 4294963200  ;;  %v314_v3 = vand.u32 4294901760, %v290_v0  ;;  %v317_v4 = vand.u32 4294901760, %v291_v1  ;;  %v293_v5 = vld [vmem:[#allocation5 + $0x18] sm:$0xff]  ;;  %v320_v6 = vand.u32 4294901760, %v292_v2  ;;  %s6346_s11 = scalar_lea.hbm %s6398_s5, %s3067_s28 }
  0x70   : > { %v5156_v7 = vld [vmem:[#allocation5 + $0x20] sm:$0xff]  ;;  %v5158_v8 = vld [vmem:[#allocation5 + $0x28] sm:$0xff]  ;;  %v323_v9 = vand.u32 4294901760, %v293_v5  ;;  %v5166_v14 = vld [vmem:[#allocation5 + $0x30] sm:$0xff]  ;;  %s2954_s13 = sshll.u32 %s6325_s10, 4  ;;  %s2941_s22 = scalar_lea.sflag [#allocation4], %s5140_s14  ;;  %s6348_s13 = int_to_ptr.vmem [resolvable:$true] %s2954_s13 }
  0x71   : > { %v5160_v10 = vpack.c.bf16 %v317_v4, %v314_v3  ;;  %v326_v11 = vand.u32 4294901760, %v5156_v7  ;;  %v329_v12 = vand.u32 4294901760, %v5158_v8  ;;  %v5168_v15 = vld [vmem:[#allocation5 + $0x38] sm:$0xff]  ;;  %v274_v16 = vld [vmem:[%s5146_s12] sm:$0xff]  ;;  %v275_v17 = vld [vmem:[%s5146_s12 + $0x8] sm:$0xff]  ;;  %v332_v20 = vand.u32 4294901760, %v5166_v14 }
  0x72   : > { %v5164_v13 = vpack.c.bf16 %v323_v9, %v320_v6  ;;  %v5174_v18 = vand.u32 4294901760, %v274_v16  ;;  %v335_v21 = vand.u32 4294901760, %v5168_v15  ;;  %v5185_v22 = vld [vmem:[#allocation5 + $0x40] sm:$0xff]  ;;  %v5187_v23 = vld [vmem:[#allocation5 + $0x48] sm:$0xff]  ;;  %v5192_v25 = vand.u32 4294901760, %v275_v17  ;;  %v276_v26 = vld [vmem:[%s5146_s12 + $0x10] sm:$0xff] }
  0x73   : > { %6525 = vst [vmem:[#allocation12_spill] sm:$0xff] %v5160_v10  ;;  %4125 = vmatprep.subr.bf16.mxu0 %v5160_v10  ;;  %v5181_v19 = vpack.c.bf16 %v329_v12, %v326_v11  ;;  %v277_v27 = vld [vmem:[%s5146_s12 + $0x18] sm:$0xff]  ;;  %v338_v28 = vand.u32 4294901760, %v5185_v22  ;;  %v341_v31 = vand.u32 4294901760, %v5187_v23  ;;  %v5207_v32 = vld [vmem:[#allocation5 + $0x50] sm:$0xff]  ;;  %v5209_v33 = vsub.f32 %v290_v0, %v314_v3  ;;  %v5229_v42 = vld [vmem:[#allocation5 + $0x60] sm:$0xff] }
  0x74   : > { %6526 = vst [vmem:[#allocation13_spill] sm:$0xff] %v5164_v13  ;;  %4127 = vmatpush3.bf16.msra.mxu0 %v5160_v10  ;;  %v5190_v24 = vsub.f32 %v274_v16, %v5174_v18  ;;  %v5204_v30 = vpack.c.bf16 %v335_v21, %v332_v20  ;;  %v5211_v34 = vsub.f32 %v291_v1, %v317_v4  ;;  %v5213_v35 = vld [vmem:[#allocation5 + $0x58] sm:$0xff]  ;;  %v5221_v38 = vand.u32 4294901760, %v276_v26  ;;  %v5231_v43 = vld [vmem:[#allocation5 + $0x68] sm:$0xff]  ;;  %v5241_v47 = vld [vmem:[#allocation5 + $0x70] sm:$0xff]  ;;  %s4857_s17 = scalar_lea.vmem %s6348_s13, 2048 }
  0x75   : > { %4129 = vmatprep.subr.bf16.mxu0 %v5164_v13  ;;  %6527 = vst [vmem:[#allocation14_spill] sm:$0xff] %v5181_v19  ;;  %v5219_v37 = vsub.f32 %v275_v17, %v5192_v25  ;;  %v5223_v39 = vand.u32 4294901760, %v277_v27  ;;  %v5225_v40 = vsub.f32 %v292_v2, %v320_v6  ;;  %v6415_v41 = vand.u32 4294901760, %v5207_v32  ;;  %v278_v50 = vld [vmem:[%s5146_s12 + $0x20] sm:$0xff]  ;;  %v279_v51 = vld [vmem:[%s5146_s12 + $0x28] sm:$0xff]  ;;  %v5248_v52 = vld [vmem:[#allocation5 + $0x78] sm:$0xff]  ;;  %p4858_p2 = scmp.ne.s32.totalorder %s6348_s13, %s4857_s17 }
  0x76   : > { %6528 = vst [vmem:[#allocation15_spill] sm:$0xff] %v5190_v24  ;;  %v6403_v29 = vand.u32 4294901760, %v5190_v24  ;;  %6529 = vst [vmem:[#allocation16_spill] sm:$0xff] %v5204_v30  ;;  %v5238_v45 = vpack.c.bf16 %v341_v31, %v338_v28  ;;  %v6414_v46 = vand.u32 4294901760, %v5213_v35  ;;  %v6406_v48 = vand.u32 4294901760, %v5209_v33  ;;  %v280_v3 = vld [vmem:[%s5146_s12 + $0x30] sm:$0xff] }
  0x77   : > { %6530 = vst [vmem:[#allocation17_spill] sm:$0xff] %v5219_v37  ;;  %v5244_v49 = vsub.f32 %v293_v5, %v323_v9  ;;  %v6402_v53 = vand.u32 4294901760, %v5219_v37  ;;  %v6405_v54 = vand.u32 4294901760, %v5211_v34  ;;  %v5253_v55 = vsub.f32 %v276_v26, %v5221_v38  ;;  %p4859_p4 = pnand %p4858_p2, %p5085_p6  ;;  %s4934_s7 = smov [#allocation8]  }
  0x78   : > { %4131 = vmatpush3.bf16.msra.mxu0 %v5164_v13  ;;  %v397_v36 = vsub.f32 %v5190_v24, %v6403_v29  ;;  %6531 = vst [vmem:[#allocation18_spill] sm:$0xff] %v5238_v45  ;;  %v5256_v56 = vsub.f32 %v277_v27, %v5223_v39  ;;  %v6413_v57 = vand.u32 4294901760, %v5229_v42  ;;  %v6404_v58 = vand.u32 4294901760, %v5225_v40  ;;  %s4861_s6 = sshll.u32 %s4934_s7, 4  ;;  %s4862_s6 = int_to_ptr.vmem [resolvable:$false] %s4861_s6 }
  0x79   : > { %4133 = vmatprep.subr.bf16.mxu0 %v5181_v19  ;;  %6532 = vst [vmem:[#allocation19_spill] sm:$0xff] %v5253_v55  ;;  %v6412_v59 = vand.u32 4294901760, %v5231_v43  ;;  %v6409_v60 = vand.u32 4294901760, %v5241_v47  ;;  %v5263_v61 = vand.u32 4294901760, %v278_v50  ;;  %v5265_v62 = vand.u32 4294901760, %v279_v51  ;;  %p4860_p8 = pneg %p4859_p4  ;;  %s4863_s8 = scalar_lea.vmem %s4862_s6, 4096 }
  0x7a   : > { %v398_v44 = vand.u32 4294901760, %v397_v36  ;;  %6533 = vst [vmem:[#allocation20_spill] sm:$0xff] %v5256_v56  ;;  %v5272_v63 = vpack.c.bf16 %v6414_v46, %v6415_v41  ;;  %v6407_v0 = vand.u32 4294901760, %v5248_v52  ;;  %v558_v1 = vsub.f32 %v5209_v33, %v6406_v48  ;;  %v283_v48 = vld [vmem:[%s5146_s12 + $0x48] sm:$0xff]  ;;  %p4864_p11 = scmp.lt.s32.totalorder %s6348_s13, %s4862_s6  ;;  %p4865_p13 = scmp.lt.s32.totalorder %s4863_s8, %s4857_s17 }
  0x7b   : > { %v6408_v2 = vand.u32 4294901760, %v5244_v49  ;;  %v5283_v4 = vsub.f32 %v5219_v37, %v6402_v53  ;;  %v565_v5 = vsub.f32 %v5211_v34, %v6405_v54  ;;  %v6410_v6 = vand.u32 4294901760, %v5253_v55  ;;  %v281_v53 = vld [vmem:[%s5146_s12 + $0x38] sm:$0xff]  ;;  %v282_v54 = vld [vmem:[%s5146_s12 + $0x40] sm:$0xff] }
  0x7c   : > { %4135 = vmatpush3.bf16.msra.mxu0 %v5181_v19  ;;  %3484 = vmatprep.mubr.f32.mxu0 %v398_v44  ;;  %6534 = vst [vmem:[#allocation21_spill] sm:$0xff] %v5272_v63  ;;  %v6411_v9 = vand.u32 4294901760, %v5256_v56  ;;  %v572_v16 = vsub.f32 %v5225_v40, %v6404_v58  ;;  %v5296_v17 = vsub.f32 %v5156_v7, %v326_v11  ;;  %v5310_v44 = vand.u32 4294901760, %v280_v3  ;;  %p4866_p3 = por %p4865_p13, %p4864_p11 }
  0x7d   : > { %4137 = vmatprep.subr.bf16.mxu0 %v5204_v30  ;;  %v5301_v26 = vsub.f32 %v5158_v8, %v329_v12  ;;  %v5305_v27 = vsub.f32 %v278_v50, %v5263_v61  ;;  %v5308_v36 = vsub.f32 %v279_v51, %v5265_v62  ;;  %v5318_v7 = vpack.c.bf16 %v6412_v59, %v6413_v57 }
  0x7e   : > { %v5324_v8 = vpack.c.bf16 %v6407_v0, %v6409_v60  ;;  %v559_v11 = vand.u32 4294901760, %v558_v1  ;;  %v579_v12 = vsub.f32 %v5244_v49, %v6408_v2  ;;  %v408_v50 = vand.u32 4294901760, %v5283_v4  ;;  %p4867_p7 = pnand %p4866_p3, %p4860_p8 }
  0x7f   : > { %6535 = vst [vmem:[#allocation22_spill] sm:$0xff] %v5305_v27  ;;  %6536 = vst [vmem:[#allocation23_spill] sm:$0xff] %v5308_v36  ;;  %v566_v51 = vand.u32 4294901760, %v565_v5  ;;  %v5333_v29 = vsub.f32 %v5253_v55, %v6410_v6  ;;  %v5338_v58 = vsub.f32 %v5256_v56, %v6411_v9  ;;  %v573_v1 = vand.u32 4294901760, %v572_v16 }
  0x80   : > { %4139 = vmatpush3.bf16.msra.mxu0 %v5204_v30  ;;  %6537 = vst [vmem:[#allocation24_spill] sm:$0xff] %v5318_v7  ;;  %6538 = vst [vmem:[#allocation25_spill] sm:$0xff] %v5324_v8  ;;  %v6419_v0 = vand.u32 4294901760, %v5296_v17  ;;  %v6417_v2 = vand.u32 4294901760, %v5301_v26  ;;  %v5344_v60 = vand.u32 4294901760, %v281_v53  ;;  %v6416_v4 = vand.u32 4294901760, %v5305_v27 }
  0x81   : > { %4141 = vmatprep.subr.bf16.mxu0 %v5238_v45  ;;  %v6418_v5 = vand.u32 4294901760, %v5308_v36  ;;  %v5350_v6 = vsub.f32 %v280_v3, %v5310_v44  ;;  %v5355_v16 = vsub.f32 %v5166_v14, %v332_v20  ;;  %v580_v9 = vand.u32 4294901760, %v579_v12 }
  0x82   : > { %v5361_v59 = vsub.f32 %v5168_v15, %v335_v21  ;;  %v5363_v57 = vand.u32 4294901760, %v282_v54  ;;  %v5365_v46 = vand.u32 4294901760, %v283_v48  ;;  %v4156_v41 = vpack.c.bf16 %v566_v51, %v559_v11 }
  0x83   : > { %6539 = vst [vmem:[#allocation26_spill] sm:$0xff] %v5350_v6  ;;  %v418_v3 = vand.u32 4294901760, %v5333_v29  ;;  %v5371_v14 = vsub.f32 %v5185_v22, %v338_v28  ;;  %v5376_v20 = vsub.f32 %v5187_v23, %v341_v31  ;;  %v428_v15 = vand.u32 4294901760, %v5338_v58  ;;  %v284_v22 = vld [vmem:[%s5146_s12 + $0x50] sm:$0xff]  ;;  %v285_v31 = vld [vmem:[%s5146_s12 + $0x58] sm:$0xff] }
  0x84   : > { %4143 = vmatpush3.bf16.msra.mxu0 %v5238_v45  ;;  %v586_v21 = vsub.f32 %v5296_v17, %v6419_v0  ;;  %v593_v29 = vsub.f32 %v5301_v26, %v6417_v2  ;;  %v5386_v11 = vsub.f32 %v281_v53, %v5344_v60  ;;  %v437_v23 = vsub.f32 %v5305_v27, %v6416_v4  ;;  %v287_v27 = vld [vmem:[%s5146_s12 + $0x68] sm:$0xff] }
  0x85   : > { %4145 = vmatprep.subr.bf16.mxu0 %v5272_v63  ;;  %v5396_v28 = vsub.f32 %v5308_v36, %v6418_v5  ;;  %v4160_v53 = vpack.c.bf16 %v580_v9, %v573_v1  ;;  %v5403_v51 = vsub.f32 %v282_v54, %v5363_v57  ;;  %v5406_v4 = vsub.f32 %v283_v48, %v5365_v46 }
  0x86   : > { %6540 = vst [vmem:[#allocation27_spill] sm:$0xff] %v5386_v11  ;;  %v5410_v0 = vand.u32 4294901760, %v284_v22  ;;  %v6543_v58 = vand.u32 4294901760, %v5207_v32  ;;  %v587_v1 = vand.u32 4294901760, %v586_v21  ;;  %v594_v12 = vand.u32 4294901760, %v593_v29  ;;  %v286_v29 = vld [vmem:[%s5146_s12 + $0x60] sm:$0xff] }
  0x87   : > { %6541 = vst [vmem:[#allocation28_spill] sm:$0xff] %v5403_v51  ;;  %6542 = vst [vmem:[#allocation29_spill] sm:$0xff] %v5406_v4  ;;  %v438_v5 = vand.u32 4294901760, %v437_v23  ;;  %v448_v2 = vand.u32 4294901760, %v5396_v28  ;;  %v5438_v28 = vand.u32 4294901760, %v285_v31  ;;  %v6548_v54 = vand.u32 4294901760, %v5371_v14 }
  0x88   : > { %4147 = vmatpush3.bf16.msra.mxu0 %v5272_v63  ;;  %v5416_v9 = vsub.f32 %v5207_v32, %v6543_v58  ;;  %v6545_v63 = vand.u32 4294901760, %v5350_v6  ;;  %v6546_v32 = vand.u32 4294901760, %v5355_v16  ;;  %v6547_v58 = vand.u32 4294901760, %v5361_v59 }
  0x89   : > { %4149 = vmatprep.subr.bf16.mxu0 %v5318_v7  ;;  %v5447_v30 = vsub.f32 %v284_v22, %v5410_v0  ;;  %v5454_v19 = vand.u32 4294901760, %v286_v29  ;;  %v6552_v22 = vand.u32 4294901760, %v5229_v42 }
  0x8a   : > { %v457_v45 = vsub.f32 %v5350_v6, %v6545_v63  ;;  %v600_v21 = vsub.f32 %v5355_v16, %v6546_v32  ;;  %v614_v63 = vsub.f32 %v5371_v14, %v6548_v54  ;;  %v6551_v6 = vand.u32 4294901760, %v5386_v11 }
  0x8b   : > { %6550 = vst [vmem:[#allocation30_spill] sm:$0xff] %v5447_v30  ;;  %v6559_v37 = vand.u32 4294901760, %v5447_v30 }
  0x8c   : > { %4151 = vmatpush3.bf16.msra.mxu0 %v5318_v7  ;;  %v6544_v7 = vand.u32 4294901760, %v5213_v35  ;;  %v467_v23 = vsub.f32 %v5386_v11, %v6551_v6  ;;  %v458_v54 = vand.u32 4294901760, %v457_v45  ;;  %v6555_v45 = vand.u32 4294901760, %v5406_v4 }
  0x8d   : > { %4153 = vmatprep.subr.bf16.mxu0 %v5324_v8  ;;  %v497_v10 = vsub.f32 %v5447_v30, %v6559_v37  ;;  %v6569_v30 = vand.u32 4294901760, %v5355_v16 }
  0x8e   : > { %v5422_v48 = vsub.f32 %v5213_v35, %v6544_v7  ;;  %v607_v35 = vsub.f32 %v5361_v59, %v6547_v58  ;;  %v4164_v7 = vpack.c.bf16 %v594_v12, %v587_v1  ;;  %v5460_v58 = vsub.f32 %v5229_v42, %v6552_v22  ;;  %v288_v42 = vld [vmem:[%s5146_s12 + $0x70] sm:$0xff] }
  0x8f   : > { %v6554_v1 = vand.u32 4294901760, %v5403_v51  ;;  %v615_v22 = vand.u32 4294901760, %v614_v63 }
  0x90   : > { %4155 = vmatpush3.bf16.msra.mxu0 %v5324_v8  ;;  %v6549_v8 = vand.u32 4294901760, %v5376_v20  ;;  %v634_v36 = vand.u32 4294901760, %v5422_v48  ;;  %v608_v6 = vand.u32 4294901760, %v607_v35  ;;  %v6556_v35 = vand.u32 4294901760, %v5416_v9 }
  0x91   : > { %4157 = vmatprep.subr.bf16.mxu0 %v4156_v41 }
  0x92   : > { %v621_v32 = vsub.f32 %v5376_v20, %v6549_v8  ;;  %v601_v8 = vand.u32 4294901760, %v600_v21  ;;  %v5476_v21 = vsub.f32 %v285_v31, %v5438_v28  ;;  %v641_v31 = vand.u32 4294901760, %v5460_v58 }
  0x93   : > { %3485 = vmatmul.mubr.f32.vlgmr.msra.gmra.mrb[0].mxu0 %v408_v50  ;;  %v6553_v50 = vand.u32 4294901760, %v5231_v43 }
  0x94   : > { %4159 = vmatpush3.bf16.msra.mxu0 %v4156_v41  ;;  %3487 = vmatprep.mubr.f32.mxu0 %v418_v3  ;;  %v477_v41 = vsub.f32 %v5403_v51, %v6554_v1  ;;  %v5473_v3 = vsub.f32 %v5406_v4, %v6555_v45  ;;  %v622_v11 = vand.u32 4294901760, %v621_v32  ;;  %v468_v1 = vand.u32 4294901760, %v467_v23 }
  0x95   : > { %v5465_v12 = vsub.f32 %v5231_v43, %v6553_v50  ;;  %4161 = vmatprep.subr.bf16.mxu0 %v4160_v53  ;;  %v628_v50 = vsub.f32 %v5416_v9, %v6556_v35  ;;  %v635_v51 = vsub.f32 %v5422_v48, %v634_v36  ;;  %v5485_v45 = vsub.f32 %v286_v29, %v5454_v19  ;;  %v289_v43 = vld [vmem:[%s5146_s12 + $0x78] sm:$0xff] }
  0x96   : > { %v5487_v4 = vand.u32 4294901760, %v287_v27  ;;  %v5491_v32 = vand.u32 4294901760, %v288_v42  ;;  %v6557_v35 = vand.u32 4294901760, %v5241_v47  ;;  %v4168_v23 = vpack.c.bf16 %v608_v6, %v601_v8 }
  0x97   : > { %3488 = vmatmul.mubr.f32.gmra.mrb[2].mxu0 %v428_v15  ;;  %v648_v63 = vand.u32 4294901760, %v5465_v12  ;;  %v478_v29 = vand.u32 4294901760, %v477_v41  ;;  %v6460_v56 = vand.u32 4294901760, %v5476_v21  ;;  %v488_v13 = vand.u32 4294901760, %v5473_v3 }
  0x98   : > { %4163 = vmatpush3.bf16.msra.mxu0 %v4160_v53  ;;  %3490 = vmatprep.mubr.f32.mxu0 %v438_v5  ;;  %v5497_v15 = vsub.f32 %v5241_v47, %v6557_v35  ;;  %v6558_v53 = vand.u32 4294901760, %v5248_v52  ;;  %v4172_v55 = vpack.c.bf16 %v622_v11, %v615_v22  ;;  %v629_v24 = vand.u32 4294901760, %v628_v50 }
  0x99   : > { %4165 = vmatprep.subr.bf16.mxu0 %v4164_v7  ;;  %v636_v47 = vand.u32 4294901760, %v635_v51  ;;  %v5511_v6 = vsub.f32 %v287_v27, %v5487_v4  ;;  %v5513_v41 = vand.u32 4294901760, %v289_v43  ;;  %v649_v11 = vsub.f32 %v5465_v12, %v648_v63 }
  0x9a   : > { %v5503_v5 = vsub.f32 %v5248_v52, %v6558_v53  ;;  %v642_v52 = vsub.f32 %v5460_v58, %v641_v31  ;;  %v5518_v3 = vsub.f32 %v288_v42, %v5491_v32  ;;  %v655_v37 = vand.u32 4294901760, %v5497_v15 }
  0x9b   : > { %3491 = vmatmul.mubr.f32.gmra.mrb[4].mxu0 %v448_v2  ;;  %v6560_v51 = vand.u32 4294901760, %v5209_v33  ;;  %v6561_v27 = vand.u32 4294901760, %v5211_v34  ;;  %v6566_v42 = vand.u32 4294901760, %v5296_v17  ;;  %v6567_v35 = vand.u32 4294901760, %v5301_v26 }
  0x9c   : > { %4167 = vmatpush3.bf16.msra.mxu0 %v4164_v7  ;;  %3493 = vmatprep.mubr.f32.mxu0 %v458_v54  ;;  %v662_v2 = vand.u32 4294901760, %v5503_v5  ;;  %v6563_v7 = vand.u32 4294901760, %v5225_v40  ;;  %v6564_v54 = vand.u32 4294901760, %v5244_v49  ;;  %v507_v8 = vsub.f32 %v5476_v21, %v6460_v56 }
  0x9d   : > { %4169 = vmatprep.subr.bf16.mxu0 %v4168_v23  ;;  %v5526_v22 = vpack.c.bf16 %v6561_v27, %v6560_v51  ;;  %v5538_v53 = vpack.c.bf16 %v6567_v35, %v6566_v42  ;;  %v6570_v51 = vand.u32 4294901760, %v5361_v59  ;;  %v526_v35 = vand.u32 4294901760, %v5511_v6 }
  0x9e   : > { %v5532_v50 = vpack.c.bf16 %v6564_v54, %v6563_v7  ;;  %v6573_v7 = vand.u32 4294901760, %v5376_v20  ;;  %v5561_v56 = vsub.f32 %v289_v43, %v5513_v41  ;;  %v656_v43 = vsub.f32 %v5497_v15, %v655_v37 }
  0x9f   : > { %6562 = vst [vmem:[#allocation31_spill] sm:$0xff] %v5526_v22  ;;  %6568 = vst [vmem:[#allocation33_spill] sm:$0xff] %v5538_v53  ;;  %v5547_v27 = vpack.c.bf16 %v6570_v51, %v6569_v30  ;;  %v6572_v22 = vand.u32 4294901760, %v5371_v14  ;;  %3494 = vmatmul.mubr.f32.gmra.mrb[6].mxu0 %v468_v1  ;;  %v5563_v53 = vpack.c.bf16 %v648_v63, %v641_v31  ;;  %v498_v51 = vand.u32 4294901760, %v497_v10 }
  0xa0   : > { %6565 = vst [vmem:[#allocation32_spill] sm:$0xff] %v5532_v50  ;;  %v6574_v50 = vand.u32 4294901760, %v5416_v9  ;;  %v5565_v30 = vpack.c.bf16 %v662_v2, %v655_v37  ;;  %4171 = vmatpush3.bf16.msra.mxu0 %v4168_v23  ;;  %3496 = vmatprep.mubr.f32.mxu0 %v478_v29  ;;  %v643_v1 = vand.u32 4294901760, %v642_v52  ;;  %v663_v31 = vsub.f32 %v5503_v5, %v662_v2 }
  0xa1   : > { %6571 = vst [vmem:[#allocation34_spill] sm:$0xff] %v5547_v27  ;;  %v5553_v54 = vpack.c.bf16 %v6573_v7, %v6572_v22  ;;  %v4176_v27 = vpack.c.bf16 %v636_v47, %v629_v24  ;;  %v6575_v22 = vand.u32 4294901760, %v5485_v45  ;;  %4173 = vmatprep.subr.bf16.mxu0 %v4172_v55  ;;  %v508_v63 = vand.u32 4294901760, %v507_v8 }
  0xa2   : > { %v5557_v42 = vpack.c.bf16 %v634_v36, %v6574_v50  ;;  %v536_v36 = vand.u32 4294901760, %v5518_v3  ;;  %v650_v50 = vand.u32 4294901760, %v649_v11  ;;  %v527_v10 = vsub.f32 %v5511_v6, %v526_v35 }
  0xa3   : > { %v517_v7 = vsub.f32 %v5485_v45, %v6575_v22  ;;  %3497 = vmatmul.mubr.f32.gmra.mrb[8].mxu0 %v488_v13  ;;  %v6471_v24 = vand.u32 4294901760, %v5561_v56  ;;  %v657_v52 = vand.u32 4294901760, %v656_v43  ;;  %v664_v11 = vand.u32 4294901760, %v663_v31 }
  0xa4   : > { %4175 = vmatpush3.bf16.msra.mxu0 %v4172_v55  ;;  %3499 = vmatprep.mubr.f32.mxu0 %v498_v51  ;;  %v537_v29 = vsub.f32 %v5518_v3, %v536_v36  ;;  %v4180_v47 = vpack.c.bf16 %v650_v50, %v643_v1  ;;  %v528_v13 = vand.u32 4294901760, %v527_v10  ;;  %v4188_v51 = vpack.c.bf16 %v5211_v34, %v5209_v33  ;;  %v6578_v50 = vld [vmem:[#allocation17_spill] sm:$0xff]  ;;  %v6579_v10 = vld [vmem:[#allocation19_spill] sm:$0xff] }
  0xa5   : > { %v518_v23 = vand.u32 4294901760, %v517_v7  ;;  %4177 = vmatprep.subr.bf16.mxu0 %v4176_v27  ;;  %v547_v8 = vsub.f32 %v5561_v56, %v6471_v24  ;;  %v4184_v55 = vpack.c.bf16 %v664_v11, %v657_v52  ;;  %v4196_v22 = vpack.c.bf16 %v5301_v26, %v5296_v17  ;;  %v5615_v17 = vld [vmem:[#allocation7] sm:$0xff]  ;;  %v5617_v26 = vld [vmem:[#allocation7 + $0x8] sm:$0xff] }
  0xa6   : > { %v538_v37 = vand.u32 4294901760, %v537_v29  ;;  %v4200_v33 = vpack.c.bf16 %v5361_v59, %v5355_v16  ;;  %v4204_v34 = vpack.c.bf16 %v5376_v20, %v5371_v14  ;;  %v4216_v59 = vpack.c.bf16 %v5503_v5, %v5497_v15  ;;  %v5619_v16 = vld [vmem:[#allocation7 + $0x10] sm:$0xff]  ;;  %v6576_v14 = vld [vmem:[#allocation15_spill] sm:$0xff]  ;;  %v5629_v15 = vld [vmem:[#allocation7 + $0x28] sm:$0xff] }
  0xa7   : > { %3500 = vmatmul.mubr.f32.gmra.mrb[10].mxu0 %v508_v63  ;;  %v548_v2 = vand.u32 4294901760, %v547_v8  ;;  %v6470_v20 = vand.u32 4294901760, %v5615_v17  ;;  %v6577_v5 = vld [vmem:[#allocation12_spill] sm:$0xff]  ;;  %v6465_v63 = vand.u32 4294901760, %v5629_v15  ;;  %v5652_v29 = vld [vmem:[#allocation7 + $0x38] sm:$0xff] }
  0xa8   : > { %4179 = vmatpush3.bf16.msra.mxu0 %v4176_v27  ;;  %3502 = vmatprep.mubr.f32.mxu0 %v518_v23  ;;  %v4192_v27 = vpack.c.bf16 %v5244_v49, %v5225_v40  ;;  %v4208_v40 = vpack.c.bf16 %v5422_v48, %v5416_v9  ;;  %v4212_v49 = vpack.c.bf16 %v5465_v12, %v5460_v58  ;;  %v6469_v9 = vand.u32 4294901760, %v5617_v26  ;;  %v5624_v48 = vld [vmem:[#allocation7 + $0x18] sm:$0xff]  ;;  %v5627_v12 = vld [vmem:[#allocation7 + $0x20] sm:$0xff]  ;;  %v5650_v23 = vld [vmem:[#allocation7 + $0x30] sm:$0xff] }
  0xa9   : > { %4181 = vmatprep.subr.bf16.mxu0 %v4180_v47  ;;  %v6468_v58 = vand.u32 4294901760, %v5619_v16  ;;  %v6467_v7 = vand.u32 4294901760, %v5624_v48  ;;  %v6466_v31 = vand.u32 4294901760, %v5627_v12  ;;  %v6581_v52 = vld [vmem:[#allocation20_spill] sm:$0xff]  ;;  %v6463_v8 = vand.u32 4294901760, %v5652_v29 }
  0xaa   : > { %v5637_v1 = vpack.c.bf16 %v6469_v9, %v6470_v20  ;;  %v6598_v9 = vand.u32 4294901760, %v6579_v10  ;;  %v6599_v20 = vld [vmem:[#allocation32_spill] sm:$0xff]  ;;  %v6600_v24 = vand.u32 4294901760, %v6581_v52 }
  0xab   : > { %3503 = vmatmul.mubr.f32.gmra.mrb[12].mxu0 %v528_v13  ;;  %v5644_v43 = vpack.c.bf16 %v6467_v7, %v6468_v58  ;;  %v5663_v11 = vpack.c.bf16 %v6465_v63, %v6466_v31  ;;  %v6464_v13 = vand.u32 4294901760, %v5650_v23  ;;  %v6594_v63 = vld [vmem:[#allocation25_spill] sm:$0xff]  ;;  %v6595_v31 = vand.u32 4294901760, %v6576_v14  ;;  %v6596_v7 = vld [vmem:[#allocation31_spill] sm:$0xff] }
  0xac   : > { %4183 = vmatpush3.bf16.msra.mxu0 %v4180_v47  ;;  %3505 = vmatprep.mubr.f32.mxu0 %v538_v37  ;;  %v6580_v47 = vld [vmem:[#allocation13_spill] sm:$0xff]  ;;  %v6582_v37 = vld [vmem:[#allocation22_spill] sm:$0xff]  ;;  %v6597_v58 = vand.u32 4294901760, %v6578_v50 }
  0xad   : > { %4185 = vmatprep.subr.bf16.mxu0 %v4184_v55  ;;  %4317 = vmatprep.subr.bf16.mxu1 %v5637_v1 }
  0xae   : > { %4319 = vmatpush3.bf16.msra.mxu1 %v5637_v1 }
  0xaf   : > { %3506 = vmatmul.mubr.f32.gmra.mrb[14].mxu0 %v548_v2  ;;  %4321 = vmatprep.subr.bf16.mxu1 %v5644_v43  ;;  %v6584_v2 = vld [vmem:[#allocation23_spill] sm:$0xff] }
  0xb0   : > { %4187 = vmatpush3.bf16.msra.mxu0 %v4184_v55  ;;  %3540 = vmatprep.mubr.f32.mxu0 %v5174_v18  ;;  %v6583_v55 = vld [vmem:[#allocation14_spill] sm:$0xff] }
  0xb1   : > { %4189 = vmatprep.subr.bf16.mxu0 %v4188_v51 }
  0xb2   : > { %4323 = vmatpush3.bf16.msra.mxu1 %v5644_v43 }
  0xb3   : > { %3541 = vmatmul.mubr.f32.vlgmr.msra.gmra.mrb[0].mxu0 %v5192_v25  ;;  %4325 = vmatprep.subr.bf16.mxu1 %v5663_v11 }
  0xb4   : > { %4191 = vmatpush3.bf16.msra.mxu0 %v4188_v51  ;;  %3543 = vmatprep.mubr.f32.mxu0 %v5221_v38  ;;  %v5677_v51 = vpack.c.bf16 %v6463_v8, %v6464_v13  ;;  %v6592_v8 = vld [vmem:[#allocation21_spill] sm:$0xff]  ;;  %v6593_v13 = vld [vmem:[#allocation24_spill] sm:$0xff] }
  0xb5   : > { %4193 = vmatprep.subr.bf16.mxu0 %v4192_v27 }
  0xb6   : > { %4327 = vmatpush3.bf16.msra.mxu1 %v5663_v11 }
  0xb7   : > { %3544 = vmatmul.mubr.f32.gmra.mrb[2].mxu0 %v5223_v39  ;;  %4329 = vmatprep.subr.bf16.mxu1 %v5677_v51 }
  0xb8   : > { %4195 = vmatpush3.bf16.msra.mxu0 %v4192_v27  ;;  %3546 = vmatprep.mubr.f32.mxu0 %v5263_v61  ;;  %v6585_v27 = vld [vmem:[#allocation26_spill] sm:$0xff] }
  0xb9   : > { %4197 = vmatprep.subr.bf16.mxu0 %v4196_v22 }
  0xba   : > { %4331 = vmatpush3.bf16.msra.mxu1 %v5677_v51 }
  0xbb   : > { %3547 = vmatmul.mubr.f32.gmra.mrb[4].mxu0 %v5265_v62 }
  0xbc   : > { %4199 = vmatpush3.bf16.msra.mxu0 %v4196_v22  ;;  %3549 = vmatprep.mubr.f32.mxu0 %v5310_v44  ;;  %v6586_v22 = vld [vmem:[#allocation16_spill] sm:$0xff] }
  0xbd   : > { %4201 = vmatprep.subr.bf16.mxu0 %v4200_v33 }
  0xbf   : > { %3550 = vmatmul.mubr.f32.gmra.mrb[6].mxu0 %v5344_v60 }
  0xc0   : > { %4203 = vmatpush3.bf16.msra.mxu0 %v4200_v33  ;;  %3552 = vmatprep.mubr.f32.mxu0 %v5363_v57  ;;  %v6587_v33 = vld [vmem:[#allocation27_spill] sm:$0xff] }
  0xc1   : > { %4205 = vmatprep.subr.bf16.mxu0 %v4204_v34 }
  0xc3   : > { %3553 = vmatmul.mubr.f32.gmra.mrb[8].mxu0 %v5365_v46 }
  0xc4   : > { %4207 = vmatpush3.bf16.msra.mxu0 %v4204_v34  ;;  %3555 = vmatprep.mubr.f32.mxu0 %v5410_v0  ;;  %v6588_v34 = vld [vmem:[#allocation28_spill] sm:$0xff] }
  0xc5   : > { %4209 = vmatprep.subr.bf16.mxu0 %v4208_v40 }
  0xc7   : > { %3556 = vmatmul.mubr.f32.gmra.mrb[10].mxu0 %v5438_v28 }
  0xc8   : > { %4211 = vmatpush3.bf16.msra.mxu0 %v4208_v40  ;;  %3558 = vmatprep.mubr.f32.mxu0 %v5454_v19  ;;  %v6589_v40 = vld [vmem:[#allocation18_spill] sm:$0xff] }
  0xc9   : > { %4213 = vmatprep.subr.bf16.mxu0 %v4212_v49 }
  0xcb   : > { %3559 = vmatmul.mubr.f32.gmra.mrb[12].mxu0 %v5487_v4 }
  0xcc   : > { %4215 = vmatpush3.bf16.msra.mxu0 %v4212_v49  ;;  %3561 = vmatprep.mubr.f32.mxu0 %v5491_v32  ;;  %v6590_v49 = vld [vmem:[#allocation29_spill] sm:$0xff] }
  0xcd   : > { %4217 = vmatprep.subr.bf16.mxu0 %v4216_v59 }
  0xcf   : > { %3562 = vmatmul.mubr.f32.gmra.mrb[14].mxu0 %v5513_v41 }
  0xd0   : > { %4219 = vmatpush3.bf16.msra.mxu0 %v4216_v59  ;;  %3596 = vmatprep.mubr.f32.mxu0 %v6576_v14  ;;  %v6591_v59 = vld [vmem:[#allocation30_spill] sm:$0xff]  ;;  %v6601_v14 = vand.u32 4294901760, %v6582_v37 }
  0xd1   : > { %4221 = vmatprep.subr.bf16.mxu0 %v6577_v5 }
  0xd3   : > { %3597 = vmatmul.mubr.f32.vlgmr.msra.gmra.mrb[0].mxu0 %v6578_v50  ;;  %v6603_v50 = vand.u32 4294901760, %v6584_v2 }
  0xd4   : > { %4223 = vmatpush3.bf16.msra.mxu0 %v6577_v5  ;;  %3599 = vmatprep.mubr.f32.mxu0 %v6579_v10  ;;  %v6609_v10 = vand.u32 4294901760, %v6591_v59 }
  0xd5   : > { %4225 = vmatprep.subr.bf16.mxu0 %v6580_v47 }
  0xd7   : > { %3600 = vmatmul.mubr.f32.gmra.mrb[2].mxu0 %v6581_v52  ;;  %v6610_v52 = vand.u32 4294901760, %v5476_v21 }
  0xd8   : > { %4227 = vmatpush3.bf16.msra.mxu0 %v6580_v47  ;;  %3602 = vmatprep.mubr.f32.mxu0 %v6582_v37  ;;  %v6611_v37 = vand.u32 4294901760, %v5485_v45 }
  0xd9   : > { %4229 = vmatprep.subr.bf16.mxu0 %v6583_v55 }
  0xdb   : > { %3603 = vmatmul.mubr.f32.gmra.mrb[4].mxu0 %v6584_v2 }
  0xdc   : > { %4231 = vmatpush3.bf16.msra.mxu0 %v6583_v55  ;;  %3605 = vmatprep.mubr.f32.mxu0 %v6585_v27 }
  0xdd   : > { %4233 = vmatprep.subr.bf16.mxu0 %v6586_v22 }
  0xdf   : > { %3606 = vmatmul.mubr.f32.gmra.mrb[6].mxu0 %v6587_v33 }
  0xe0   : > { %4235 = vmatpush3.bf16.msra.mxu0 %v6586_v22  ;;  %3608 = vmatprep.mubr.f32.mxu0 %v6588_v34 }
  0xe1   : > { %4237 = vmatprep.subr.bf16.mxu0 %v6589_v40 }
  0xe3   : > { %3609 = vmatmul.mubr.f32.gmra.mrb[8].mxu0 %v6590_v49 }
  0xe4   : > { %4239 = vmatpush3.bf16.msra.mxu0 %v6589_v40  ;;  %3611 = vmatprep.mubr.f32.mxu0 %v6591_v59 }
  0xe5   : > { %4241 = vmatprep.subr.bf16.mxu0 %v6592_v8 }
  0xe7   : > { %3612 = vmatmul.mubr.f32.gmra.mrb[10].mxu0 %v5476_v21  ;;  %v6612_v21 = vand.u32 4294901760, %v5561_v56 }
  0xe8   : > { %4243 = vmatpush3.bf16.msra.mxu0 %v6592_v8  ;;  %3614 = vmatprep.mubr.f32.mxu0 %v5485_v45  ;;  %v6615_v45 = vand.u32 4294901760, %v5615_v17 }
  0xe9   : > { %4245 = vmatprep.subr.bf16.mxu0 %v6593_v13 }
  0xeb   : > { %3615 = vmatmul.mubr.f32.gmra.mrb[12].mxu0 %v5511_v6  ;;  %v6617_v6 = vand.u32 4294901760, %v5617_v26 }
  0xec   : > { %4247 = vmatpush3.bf16.msra.mxu0 %v6593_v13  ;;  %3617 = vmatprep.mubr.f32.mxu0 %v5518_v3  ;;  %v1629_v3 = vld [vmem:[#allocation7 + $0x70] sm:$0xff] }
  0xed   : > { %4249 = vmatprep.subr.bf16.mxu0 %v6594_v63 }
  0xef   : > { %3618 = vmatmul.mubr.f32.gmra.mrb[14].mxu0 %v5561_v56 }
  0xf0   : > { %4251 = vmatpush3.bf16.msra.mxu0 %v6594_v63  ;;  %3652 = vmatprep.mubr.f32.mxu0 %v6595_v31  ;;  %v6602_v31 = vld [vmem:[#allocation33_spill] sm:$0xff] }
  0xf1   : > { %4253 = vmatprep.subr.bf16.mxu0 %v6596_v7 }
  0xf3   : > { %3653 = vmatmul.mubr.f32.vlgmr.msra.gmra.mrb[0].mxu0 %v6597_v58  ;;  %v6604_v58 = vand.u32 4294901760, %v6585_v27 }
  0xf4   : > { %4255 = vmatpush3.bf16.msra.mxu0 %v6596_v7  ;;  %3655 = vmatprep.mubr.f32.mxu0 %v6598_v9  ;;  %v6605_v9 = vld [vmem:[#allocation34_spill] sm:$0xff]  ;;  %v6606_v7 = vand.u32 4294901760, %v6587_v33 }
  0xf5   : > { %4257 = vmatprep.subr.bf16.mxu0 %v6599_v20 }
  0xf7   : > { %3656 = vmatmul.mubr.f32.gmra.mrb[2].mxu0 %v6600_v24  ;;  %v6607_v24 = vand.u32 4294901760, %v6588_v34 }
  0xf8   : > { %4259 = vmatpush3.bf16.msra.mxu0 %v6599_v20  ;;  %3658 = vmatprep.mubr.f32.mxu0 %v6601_v14  ;;  %v6608_v20 = vand.u32 4294901760, %v6590_v49 }
  0xf9   : > { %4261 = vmatprep.subr.bf16.mxu0 %v6602_v31 }
  0xfb   : > { %3659 = vmatmul.mubr.f32.gmra.mrb[4].mxu0 %v6603_v50 }
  0xfc   : > { %4263 = vmatpush3.bf16.msra.mxu0 %v6602_v31  ;;  %3661 = vmatprep.mubr.f32.mxu0 %v6604_v58 }
  0xfd   : > { %4265 = vmatprep.subr.bf16.mxu0 %v6605_v9 }
  0xff   : > { %3662 = vmatmul.mubr.f32.gmra.mrb[6].mxu0 %v6606_v7 }
 0x100   : > { %4267 = vmatpush3.bf16.msra.mxu0 %v6605_v9  ;;  %3664 = vmatprep.mubr.f32.mxu0 %v6607_v24 }
 0x101   : > { %4269 = vmatprep.subr.bf16.mxu0 %v5553_v54 }
 0x103   : > { %3665 = vmatmul.mubr.f32.gmra.mrb[8].mxu0 %v6608_v20 }
 0x104   : > { %4271 = vmatpush3.bf16.msra.mxu0 %v5553_v54  ;;  %3667 = vmatprep.mubr.f32.mxu0 %v6609_v10  ;;  %v1681_v54 = vand.u32 4294901760, %v1629_v3 }
 0x105   : > { %4273 = vmatprep.subr.bf16.mxu0 %v5557_v42 }
 0x107   : > { %3668 = vmatmul.mubr.f32.gmra.mrb[10].mxu0 %v6610_v52 }
 0x108   : > { %4275 = vmatpush3.bf16.msra.mxu0 %v5557_v42  ;;  %3670 = vmatprep.mubr.f32.mxu0 %v6611_v37 }
 0x109   : > { %4277 = vmatprep.subr.bf16.mxu0 %v5563_v53 }
 0x10b   : > { %3671 = vmatmul.mubr.f32.gmra.mrb[12].mxu0 %v526_v35 }
 0x10c   : > { %4279 = vmatpush3.bf16.msra.mxu0 %v5563_v53  ;;  %3673 = vmatprep.mubr.f32.mxu0 %v536_v36  ;;  %v1630_v53 = vld [vmem:[#allocation7 + $0x78] sm:$0xff] }
 0x10d   : > { %4281 = vmatprep.subr.bf16.mxu0 %v5565_v30  ;;  %v1684_v42 = vand.u32 4294901760, %v1630_v53 }
 0x10f   : > { %3674 = vmatmul.mubr.f32.gmra.mrb[14].mxu0 %v6612_v21  ;;  %v5823_v36 = vpack.c.bf16 %v1684_v42, %v1681_v54 }
 0x110   : > { %4283 = vmatpush3.bf16.msra.mxu0 %v5565_v30  ;;  %3708 = vmatprep.mubr.f32.mxu0 %v5174_v18 }
 0x111   : > { %4285 = vmatprep.subr.bf16.mxu0 %v6577_v5  ;;  %6619 = vst [vmem:[#allocation13_spill] sm:$0xff] %v5823_v36 }
 0x113   : > { %3709 = vmatmul.mubr.f32.vlgmr.msra.gmra.mrb[0].mxu0 %v5192_v25 }
 0x114   : > { %4287 = vmatpush3.bf16.msra.mxu0 %v6577_v5  ;;  %3711 = vmatprep.mubr.f32.mxu0 %v5221_v38 }
 0x115   : > { %4289 = vmatprep.subr.bf16.mxu0 %v6580_v47 }
 0x117   : > { %3712 = vmatmul.mubr.f32.gmra.mrb[2].mxu0 %v5223_v39 }
 0x118   : > { %4291 = vmatpush3.bf16.msra.mxu0 %v6580_v47  ;;  %3714 = vmatprep.mubr.f32.mxu0 %v5263_v61 }
 0x119   : > { %4293 = vmatprep.subr.bf16.mxu0 %v6583_v55 }
 0x11b   : > { %3715 = vmatmul.mubr.f32.gmra.mrb[4].mxu0 %v5265_v62 }
 0x11c   : > { %4295 = vmatpush3.bf16.msra.mxu0 %v6583_v55  ;;  %3717 = vmatprep.mubr.f32.mxu0 %v5310_v44 }
 0x11d   : > { %4297 = vmatprep.subr.bf16.mxu0 %v6586_v22 }
 0x11f   : > { %3718 = vmatmul.mubr.f32.gmra.mrb[6].mxu0 %v5344_v60 }
 0x120   : > { %4299 = vmatpush3.bf16.msra.mxu0 %v6586_v22  ;;  %3720 = vmatprep.mubr.f32.mxu0 %v5363_v57 }
 0x121   : > { %4301 = vmatprep.subr.bf16.mxu0 %v6589_v40 }
 0x123   : > { %3721 = vmatmul.mubr.f32.gmra.mrb[8].mxu0 %v5365_v46 }
 0x124   : > { %4303 = vmatpush3.bf16.msra.mxu0 %v6589_v40  ;;  %3723 = vmatprep.mubr.f32.mxu0 %v5410_v0 }
 0x125   : > { %4305 = vmatprep.subr.bf16.mxu0 %v6592_v8 }
 0x127   : > { %3724 = vmatmul.mubr.f32.gmra.mrb[10].mxu0 %v5438_v28 }
 0x128   : > { %4307 = vmatpush3.bf16.msra.mxu0 %v6592_v8  ;;  %3726 = vmatprep.mubr.f32.mxu0 %v5454_v19 }
 0x129   : > { %4309 = vmatprep.subr.bf16.mxu0 %v6593_v13 }
 0x12b   : > { %3727 = vmatmul.mubr.f32.gmra.mrb[12].mxu0 %v5487_v4 }
 0x12c   : > { %4311 = vmatpush3.bf16.msra.mxu0 %v6593_v13  ;;  %3729 = vmatprep.mubr.f32.mxu0 %v5491_v32 }
 0x12d   : > { %4313 = vmatprep.subr.bf16.mxu0 %v6594_v63 }
 0x12f   : > { %3730 = vmatmul.mubr.f32.gmra.mrb[14].mxu0 %v5513_v41 }
 0x130   : > { %4315 = vmatpush3.bf16.msra.mxu0 %v6594_v63  ;;  %3764 = vmatprep.mubr.f32.mxu0 %v5174_v18  ;;  %v1623_v18 = vld [vmem:[#allocation7 + $0x40] sm:$0xff] }
 0x133   : > { %3765 = vmatmul.mubr.f32.vlgmr.msra.gmra.mrb[0].mxu0 %v5192_v25  ;;  %v1624_v25 = vld [vmem:[#allocation7 + $0x48] sm:$0xff] }
 0x134   : > { %3767 = vmatprep.mubr.f32.mxu0 %v5221_v38  ;;  %v1663_v38 = vand.u32 4294901760, %v1623_v18 }
 0x136   : > { %v5836_v13 = vsub.f32 %v1623_v18, %v1663_v38 }
 0x137   : > { %3768 = vmatmul.mubr.f32.gmra.mrb[2].mxu0 %v5223_v39  ;;  %v1666_v39 = vand.u32 4294901760, %v1624_v25 }
 0x138   : > { %3770 = vmatprep.mubr.f32.mxu0 %v5263_v61  ;;  %6620 = vst [vmem:[#allocation20_spill] sm:$0xff] %v5836_v13  ;;  %v6479_v55 = vand.u32 4294901760, %v5836_v13 }
 0x139   : > { %v5799_v56 = vpack.c.bf16 %v1666_v39, %v1663_v38  ;;  %v5838_v8 = vsub.f32 %v1624_v25, %v1666_v39  ;;  %v5876_v25 = vsub.f32 %v1629_v3, %v1681_v54  ;;  %v5878_v38 = vsub.f32 %v1630_v53, %v1684_v42 }
 0x13a   : > { %v1939_v27 = vsub.f32 %v5836_v13, %v6479_v55 }
 0x13b   : > { %3771 = vmatmul.mubr.f32.gmra.mrb[4].mxu0 %v5265_v62  ;;  %4333 = vmatprep.subr.bf16.mxu1 %v5799_v56  ;;  %v1627_v62 = vld [vmem:[#allocation7 + $0x60] sm:$0xff]  ;;  %6621 = vst [vmem:[#allocation22_spill] sm:$0xff] %v5838_v8  ;;  %v6478_v2 = vand.u32 4294901760, %v5838_v8  ;;  %6626 = vst [vmem:[#allocation27_spill] sm:$0xff] %v5876_v25  ;;  %v5898_v3 = vpack.c.bf16 %v5838_v8, %v5836_v13  ;;  %v5910_v42 = vpack.c.bf16 %v5878_v38, %v5876_v25 }
 0x13c   : > { %3773 = vmatprep.mubr.f32.mxu0 %v5310_v44  ;;  %4335 = vmatpush3.bf16.msra.mxu1 %v5799_v56  ;;  %v1675_v44 = vand.u32 4294901760, %v1627_v62  ;;  %v1940_v40 = vand.u32 4294901760, %v1939_v27  ;;  %6627 = vst [vmem:[#allocation28_spill] sm:$0xff] %v5878_v38  ;;  %v6630_v27 = vand.u32 4294901760, %v5627_v12 }
 0x13d   : > { %v1946_v34 = vsub.f32 %v5838_v8, %v6478_v2 }
 0x13e   : > { %v5860_v58 = vsub.f32 %v1627_v62, %v1675_v44 }
 0x13f   : > { %3774 = vmatmul.mubr.f32.gmra.mrb[6].mxu0 %v5344_v60  ;;  %v1947_v14 = vand.u32 4294901760, %v1946_v34  ;;  %v5925_v34 = vsub.f32 %v5627_v12, %v6630_v27 }
 0x140   : > { %3776 = vmatprep.mubr.f32.mxu0 %v5363_v57  ;;  %v1625_v57 = vld [vmem:[#allocation7 + $0x50] sm:$0xff]  ;;  %6624 = vst [vmem:[#allocation26_spill] sm:$0xff] %v5860_v58  ;;  %v6475_v10 = vand.u32 4294901760, %v5860_v58 }
 0x141   : > { %v1669_v60 = vand.u32 4294901760, %v1625_v57  ;;  %v5864_v7 = vpack.c.bf16 %v1947_v14, %v1940_v40  ;;  %v6631_v40 = vand.u32 4294901760, %v5629_v15 }
 0x142   : > { %v1967_v21 = vsub.f32 %v5860_v58, %v6475_v10 }
 0x143   : > { %3777 = vmatmul.mubr.f32.gmra.mrb[8].mxu0 %v5365_v46  ;;  %v1626_v46 = vld [vmem:[#allocation7 + $0x58] sm:$0xff]  ;;  %v5845_v22 = vsub.f32 %v1625_v57, %v1669_v60  ;;  %v5930_v14 = vsub.f32 %v5629_v15, %v6631_v40 }
 0x144   : > { %3779 = vmatprep.mubr.f32.mxu0 %v5410_v0  ;;  %v1672_v61 = vand.u32 4294901760, %v1626_v46  ;;  %v1628_v0 = vld [vmem:[#allocation7 + $0x68] sm:$0xff]  ;;  %v1968_v39 = vand.u32 4294901760, %v1967_v21 }
 0x145   : > { %6622 = vst [vmem:[#allocation14_spill] sm:$0xff] %v5845_v22  ;;  %v6477_v49 = vand.u32 4294901760, %v5845_v22 }
 0x146   : > { %v5847_v33 = vsub.f32 %v1626_v46, %v1672_v61  ;;  %v6473_v46 = vand.u32 4294901760, %v5876_v25 }
 0x147   : > { %3780 = vmatmul.mubr.f32.gmra.mrb[10].mxu0 %v5438_v28  ;;  %v1953_v31 = vsub.f32 %v5845_v22, %v6477_v49 }
 0x148   : > { %3782 = vmatprep.mubr.f32.mxu0 %v5454_v19  ;;  %v5803_v19 = vpack.c.bf16 %v1672_v61, %v1669_v60  ;;  %6623 = vst [vmem:[#allocation23_spill] sm:$0xff] %v5847_v33  ;;  %v6476_v59 = vand.u32 4294901760, %v5847_v33  ;;  %v6472_v60 = vand.u32 4294901760, %v5878_v38  ;;  %v1981_v62 = vsub.f32 %v5876_v25, %v6473_v46 }
 0x149   : > { %v1954_v24 = vand.u32 4294901760, %v1953_v31  ;;  %v5902_v53 = vpack.c.bf16 %v5847_v33, %v5845_v22 }
 0x14a   : > { %6613 = vst [vmem:[#allocation15_spill] sm:$0xff] %v5803_v19  ;;  %4337 = vmatprep.subr.bf16.mxu1 %v5803_v19  ;;  %v1960_v50 = vsub.f32 %v5847_v33, %v6476_v59 }
 0x14b   : > { %3783 = vmatmul.mubr.f32.gmra.mrb[12].mxu0 %v5487_v4  ;;  %v1678_v4 = vand.u32 4294901760, %v1628_v0  ;;  %4339 = vmatpush3.bf16.msra.mxu1 %v5803_v19 }
 0x14c   : > { %3785 = vmatprep.mubr.f32.mxu0 %v5491_v32  ;;  %v5812_v32 = vsub.f32 %v5615_v17, %v6615_v45  ;;  %v1961_v20 = vand.u32 4294901760, %v1960_v50  ;;  %v6481_v50 = vand.u32 4294901760, %v5925_v34 }
 0x14d   : > { %v5807_v28 = vpack.c.bf16 %v1678_v4, %v1675_v44  ;;  %v5862_v9 = vsub.f32 %v1628_v0, %v1678_v4  ;;  %v1988_v0 = vsub.f32 %v5878_v38, %v6472_v60  ;;  %v1982_v44 = vand.u32 4294901760, %v1981_v62 }
 0x14e   : > { %6616 = vst [vmem:[#allocation17_spill] sm:$0xff] %v5812_v32  ;;  %v6488_v35 = vand.u32 4294901760, %v5812_v32  ;;  %v5868_v37 = vpack.c.bf16 %v1961_v20, %v1954_v24  ;;  %v6480_v24 = vand.u32 4294901760, %v5930_v14  ;;  %v1911_v62 = vsub.f32 %v5925_v34, %v6481_v50 }
 0x14f   : > { %3786 = vmatmul.mubr.f32.gmra.mrb[14].mxu0 %v5513_v41  ;;  %6614 = vst [vmem:[#allocation12_spill] sm:$0xff] %v5807_v28  ;;  %v5817_v41 = vsub.f32 %v5617_v26, %v6617_v6  ;;  %4341 = vmatprep.subr.bf16.mxu1 %v5807_v28  ;;  %6625 = vst [vmem:[#allocation16_spill] sm:$0xff] %v5862_v9  ;;  %v6474_v52 = vand.u32 4294901760, %v5862_v9  ;;  %v1989_v4 = vand.u32 4294901760, %v1988_v0 }
 0x150   : > { %4343 = vmatpush3.bf16.msra.mxu1 %v5807_v28  ;;  %v1883_v17 = vsub.f32 %v5812_v32, %v6488_v35  ;;  %v5906_v54 = vpack.c.bf16 %v5862_v9, %v5860_v58  ;;  %v1918_v0 = vsub.f32 %v5930_v14, %v6480_v24 }
 0x151   : > { %6618 = vst [vmem:[#allocation19_spill] sm:$0xff] %v5817_v41  ;;  %v6487_v30 = vand.u32 4294901760, %v5817_v41  ;;  %4345 = vmatprep.subr.bf16.mxu1 %v5823_v36  ;;  %v1974_v18 = vsub.f32 %v5862_v9, %v6474_v52  ;;  %v5890_v45 = vpack.c.bf16 %v1989_v4, %v1982_v44  ;;  %v5894_v6 = vpack.c.bf16 %v5817_v41, %v5812_v32 }
 0x152   : > { %v1884_v5 = vand.u32 4294901760, %v1883_v17  ;;  %v6628_v17 = vand.u32 4294901760, %v5619_v16  ;;  %v1919_v59 = vand.u32 4294901760, %v1918_v0 }
 0x153   : > { %v1890_v26 = vsub.f32 %v5817_v41, %v6487_v30  ;;  %v1975_v57 = vand.u32 4294901760, %v1974_v18 }
 0x154   : > { %4347 = vmatpush3.bf16.msra.mxu1 %v5823_v36 }
 0x155   : > { %v1891_v63 = vand.u32 4294901760, %v1890_v26  ;;  %v5882_v61 = vpack.c.bf16 %v1975_v57, %v1968_v39  ;;  %v5915_v26 = vsub.f32 %v5619_v16, %v6628_v17  ;;  %v5935_v16 = vld [vmem:[%s6395_s2] ss:$0 sm:$0xff]  ;;  %v6632_v17 = vand.u32 4294901760, %v5650_v23 }
 0x157   : > { %v5833_v47 = vpack.c.bf16 %v1891_v63, %v1884_v5  ;;  %v6629_v5 = vand.u32 4294901760, %v5624_v48  ;;  %v6483_v31 = vand.u32 4294901760, %v5915_v26 }
 0x159   : > { %4349 = vmatprep.subr.bf16.mxu1 %v5833_v47  ;;  %v5920_v63 = vsub.f32 %v5624_v48, %v6629_v5  ;;  %v1897_v18 = vsub.f32 %v5915_v26, %v6483_v31  ;;  %v5958_v5 = vsub.f32 %v5650_v23, %v6632_v17  ;;  %v1912_v17 = vand.u32 4294901760, %v1911_v62 }
 0x15b   : > { %v6482_v48 = vand.u32 4294901760, %v5920_v63  ;;  %v1898_v46 = vand.u32 4294901760, %v1897_v18  ;;  %v5993_v24 = vpack.c.bf16 %v1919_v59, %v1912_v17 }
 0x15d   : > { %v1904_v39 = vsub.f32 %v5920_v63, %v6482_v48 }
 0x15f   : > { %v1905_v52 = vand.u32 4294901760, %v1904_v39 }
 0x206   : > { %v3766_v12 = vpop.f32.mrb[0].mxu0 }
 0x207   : > { %v4508_v20 = vadd.f32 %v3766_v12, %v5935_v16  ;;  %v1505_v21 = vpop.f32.mrb[1].mxu0 }
 0x208   : > { %v4509_v15 = vadd.f32 %v5935_v16, %v1505_v21 }
 0x209   : > { %v1600_v57 = vmax.f32 %v4508_v20, 0.0  ;;  %v6633_v20 = vand.u32 4294901760, %v5652_v29 }
 0x20a   : > { %v1599_v44 = vmax.f32 %v4509_v15, 0.0  ;;  %v3769_v4 = vpop.f32.mrb[2].mxu0 }
 0x20b   : > { %v5960_v27 = vand.u32 4294901760, %v1600_v57  ;;  %v4510_v40 = vadd.f32 %v3769_v4, %v5935_v16  ;;  %v1517_v12 = vpop.f32.mrb[3].mxu0  ;;  %v5966_v21 = vsub.f32 %v5652_v29, %v6633_v20  ;;  %v6486_v29 = vand.u32 4294901760, %v5958_v5 }
 0x20c   : > { %v5968_v60 = vand.u32 4294901760, %v1599_v44  ;;  %v4511_v15 = vadd.f32 %v5935_v16, %v1517_v12 }
 0x20d   : > { %v5972_v10 = vsub.f32 %v1600_v57, %v5960_v27  ;;  %v1602_v23 = vmax.f32 %v4510_v40, 0.0  ;;  %v6490_v39 = vand.u32 4294901760, %v5966_v21 }
 0x20e   : > { %v5975_v4 = vsub.f32 %v1599_v44, %v5968_v60  ;;  %v1601_v49 = vmax.f32 %v4511_v15, 0.0  ;;  %v3772_v2 = vpop.f32.mrb[4].mxu0  ;;  %v4352_v44 = vpack.c.bf16 %v1905_v52, %v1898_v46  ;;  %v1925_v52 = vsub.f32 %v5958_v5, %v6486_v29 }
 0x20f   : > { %v5978_v20 = vand.u32 4294901760, %v1602_v23  ;;  %v4512_v55 = vadd.f32 %v3772_v2, %v5935_v16  ;;  %v1529_v12 = vpop.f32.mrb[5].mxu0  ;;  %v6484_v18 = vand.u32 4294901760, %v5972_v10 }
 0x210   : > { %v5983_v57 = vand.u32 4294901760, %v1601_v49  ;;  %v4513_v62 = vadd.f32 %v5935_v16, %v1529_v12  ;;  %v6485_v0 = vand.u32 4294901760, %v5975_v4 }
 0x211   : > { %v5988_v40 = vsub.f32 %v1602_v23, %v5978_v20  ;;  %v1604_v15 = vmax.f32 %v4512_v55, 0.0  ;;  %v1732_v2 = vsub.f32 %v5972_v10, %v6484_v18 }
 0x212   : > { %v5996_v50 = vsub.f32 %v1601_v49, %v5983_v57  ;;  %v1603_v48 = vmax.f32 %v4513_v62, 0.0  ;;  %v3775_v31 = vpop.f32.mrb[6].mxu0  ;;  %v1722_v12 = vsub.f32 %v5975_v4, %v6485_v0  ;;  %v1932_v49 = vsub.f32 %v5966_v21, %v6490_v39 }
 0x213   : > { %v6004_v55 = vand.u32 4294901760, %v1604_v15  ;;  %v4514_v46 = vadd.f32 %v3775_v31, %v5935_v16  ;;  %v1541_v23 = vpop.f32.mrb[7].mxu0  ;;  %v6493_v59 = vand.u32 4294901760, %v5988_v40  ;;  %v1733_v35 = vand.u32 4294901760, %v1732_v2 }
 0x214   : > { %v6011_v17 = vand.u32 4294901760, %v1603_v48  ;;  %v4515_v62 = vadd.f32 %v5935_v16, %v1541_v23  ;;  %v1723_v18 = vand.u32 4294901760, %v1722_v12  ;;  %v6495_v0 = vand.u32 4294901760, %v5996_v50 }
 0x215   : > { %v6016_v29 = vsub.f32 %v1604_v15, %v6004_v55  ;;  %v1606_v30 = vmax.f32 %v4514_v46, 0.0  ;;  %v1752_v31 = vsub.f32 %v5988_v40, %v6493_v59  ;;  %v1926_v23 = vand.u32 4294901760, %v1925_v52 }
 0x216   : > { %v6022_v38 = vsub.f32 %v1603_v48, %v6011_v17  ;;  %v1605_v39 = vmax.f32 %v4515_v62, 0.0  ;;  %v3778_v25 = vpop.f32.mrb[8].mxu0  ;;  %3820 = vmatprep.mubr.f32.mxu1 %v1723_v18  ;;  %v1742_v12 = vsub.f32 %v5996_v50, %v6495_v0  ;;  %v1933_v59 = vand.u32 4294901760, %v1932_v49 }
 0x217   : > { %v6027_v9 = vand.u32 4294901760, %v1606_v30  ;;  %v4516_v15 = vadd.f32 %v3778_v25, %v5935_v16  ;;  %v1553_v2 = vpop.f32.mrb[9].mxu0  ;;  %3821 = vmatmul.mubr.f32.vlgmr.msra.gmra.mrb[0].mxu1 %v1733_v35  ;;  %v6498_v46 = vand.u32 4294901760, %v6016_v29  ;;  %v1753_v33 = vand.u32 4294901760, %v1752_v31 }
 0x218   : > { %v6031_v58 = vand.u32 4294901760, %v1605_v39  ;;  %v4517_v48 = vadd.f32 %v5935_v16, %v1553_v2  ;;  %4351 = vmatpush3.bf16.msra.mxu1 %v5833_v47  ;;  %v1743_v18 = vand.u32 4294901760, %v1742_v12  ;;  %v6500_v62 = vand.u32 4294901760, %v6022_v38 }
 0x219   : > { %v6037_v52 = vsub.f32 %v1606_v30, %v6027_v9  ;;  %v1608_v0 = vmax.f32 %v4516_v15, 0.0  ;;  %4353 = vmatprep.subr.bf16.mxu1 %v4352_v44  ;;  %v1772_v35 = vsub.f32 %v6016_v29, %v6498_v46  ;;  %v4360_v22 = vpack.c.bf16 %v1933_v59, %v1926_v23 }
 0x21a   : > { %v6043_v25 = vsub.f32 %v1605_v39, %v6031_v58  ;;  %v1607_v49 = vmax.f32 %v4517_v48, 0.0  ;;  %v3781_v2 = vpop.f32.mrb[10].mxu0  ;;  %3823 = vmatprep.mubr.f32.mxu1 %v1743_v18  ;;  %v1762_v47 = vsub.f32 %v6022_v38, %v6500_v62 }
 0x21b   : > { %v6048_v12 = vand.u32 4294901760, %v1608_v0  ;;  %v4518_v30 = vadd.f32 %v3781_v2, %v5935_v16  ;;  %v1565_v31 = vpop.f32.mrb[11].mxu0  ;;  %3824 = vmatmul.mubr.f32.gmra.mrb[2].mxu1 %v1753_v33  ;;  %v6502_v15 = vand.u32 4294901760, %v6037_v52  ;;  %v1773_v13 = vand.u32 4294901760, %v1772_v35 }
 0x21c   : > { %v6052_v46 = vand.u32 4294901760, %v1607_v49  ;;  %v4519_v39 = vadd.f32 %v5935_v16, %v1565_v31  ;;  %4355 = vmatpush3.bf16.msra.mxu1 %v4352_v44  ;;  %v1763_v48 = vand.u32 4294901760, %v1762_v47  ;;  %v6503_v18 = vand.u32 4294901760, %v6043_v25 }
 0x21d   : > { %v6057_v8 = vsub.f32 %v1608_v0, %v6048_v12  ;;  %v1610_v62 = vmax.f32 %v4518_v30, 0.0  ;;  %4357 = vmatprep.subr.bf16.mxu1 %v5993_v24  ;;  %v1792_v33 = vsub.f32 %v6037_v52, %v6502_v15 }
 0x21e   : > { %v6064_v59 = vsub.f32 %v1607_v49, %v6052_v46  ;;  %v1609_v23 = vmax.f32 %v4519_v39, 0.0  ;;  %v3784_v2 = vpop.f32.mrb[12].mxu0  ;;  %3826 = vmatprep.mubr.f32.mxu1 %v1763_v48  ;;  %v1782_v44 = vsub.f32 %v6043_v25, %v6503_v18 }
 0x21f   : > { %v6069_v0 = vand.u32 4294901760, %v1610_v62  ;;  %v4520_v35 = vadd.f32 %v3784_v2, %v5935_v16  ;;  %v1577_v47 = vpop.f32.mrb[13].mxu0  ;;  %3827 = vmatmul.mubr.f32.gmra.mrb[4].mxu1 %v1773_v13  ;;  %v6508_v30 = vand.u32 4294901760, %v6057_v8  ;;  %v1793_v41 = vand.u32 4294901760, %v1792_v33 }
 0x220   : > { %v6073_v31 = vand.u32 4294901760, %v1609_v23  ;;  %v4521_v49 = vadd.f32 %v5935_v16, %v1577_v47  ;;  %4359 = vmatpush3.bf16.msra.mxu1 %v5993_v24  ;;  %v1783_v39 = vand.u32 4294901760, %v1782_v44  ;;  %v6509_v48 = vand.u32 4294901760, %v6064_v59 }
 0x221   : > { %v6079_v15 = vsub.f32 %v1610_v62, %v6069_v0  ;;  %v1612_v18 = vmax.f32 %v4520_v35, 0.0  ;;  %4361 = vmatprep.subr.bf16.mxu1 %v4360_v22  ;;  %v1812_v13 = vsub.f32 %v6057_v8, %v6508_v30 }
 0x222   : > { %v6085_v2 = vsub.f32 %v1609_v23, %v6073_v31  ;;  %v1611_v32 = vmax.f32 %v4521_v49, 0.0  ;;  %v3787_v47 = vpop.f32.mrb[14].mxu0  ;;  %3829 = vmatprep.mubr.f32.mxu1 %v1783_v39  ;;  %v1802_v24 = vsub.f32 %v6064_v59, %v6509_v48 }
 0x223   : > { %v6090_v44 = vand.u32 4294901760, %v1612_v18  ;;  %v4522_v62 = vadd.f32 %v3787_v47, %v5935_v16  ;;  %v1589_v33 = vpop.f32.mrb[15].mxu0  ;;  %3830 = vmatmul.mubr.f32.gmra.mrb[6].mxu1 %v1793_v41  ;;  %v1831_v35 = vand.u32 4294901760, %v6079_v15  ;;  %v1813_v28 = vand.u32 4294901760, %v1812_v13 }
 0x224   : > { %v6094_v36 = vand.u32 4294901760, %v1611_v32  ;;  %v4523_v23 = vadd.f32 %v5935_v16, %v1589_v33  ;;  %4363 = vmatpush3.bf16.msra.mxu1 %v4360_v22  ;;  %v1803_v49 = vand.u32 4294901760, %v1802_v24  ;;  %v1821_v39 = vand.u32 4294901760, %v6085_v2 }
 0x225   : > { %v6099_v30 = vsub.f32 %v1612_v18, %v6090_v44  ;;  %v1614_v48 = vmax.f32 %v4522_v62, 0.0  ;;  %4365 = vmatprep.subr.bf16.mxu1 %v5864_v7  ;;  %v1832_v41 = vsub.f32 %v6079_v15, %v1831_v35 }
 0x226   : > { %v6106_v47 = vsub.f32 %v1611_v32, %v6094_v36  ;;  %v1613_v19 = vmax.f32 %v4523_v23, 0.0  ;;  %3832 = vmatprep.mubr.f32.mxu1 %v1803_v49  ;;  %v1822_v22 = vsub.f32 %v6085_v2, %v1821_v39 }
 0x227   : > { %v6111_v16 = vand.u32 4294901760, %v1614_v48  ;;  %3833 = vmatmul.mubr.f32.gmra.mrb[8].mxu1 %v1813_v28  ;;  %v1851_v18 = vand.u32 4294901760, %v6099_v30  ;;  %v1833_v33 = vand.u32 4294901760, %v1832_v41 }
 0x228   : > { %v6114_v13 = vand.u32 4294901760, %v1613_v19  ;;  %4367 = vmatpush3.bf16.msra.mxu1 %v5864_v7  ;;  %v1823_v24 = vand.u32 4294901760, %v1822_v22  ;;  %v1841_v62 = vand.u32 4294901760, %v6106_v47 }
 0x229   : > { %v6119_v32 = vsub.f32 %v1614_v48, %v6111_v16  ;;  %4369 = vmatprep.subr.bf16.mxu1 %v5868_v37  ;;  %v1852_v23 = vsub.f32 %v6099_v30, %v1851_v18 }
 0x22a   : > { %v6126_v28 = vsub.f32 %v1613_v19, %v6114_v13  ;;  %3835 = vmatprep.mubr.f32.mxu1 %v1823_v24  ;;  %v1842_v7 = vsub.f32 %v6106_v47, %v1841_v62 }
 0x22b   : > { %3836 = vmatmul.mubr.f32.gmra.mrb[10].mxu1 %v1833_v33  ;;  %v1871_v49 = vand.u32 4294901760, %v6119_v32  ;;  %v1853_v22 = vand.u32 4294901760, %v1852_v23  ;;  %v4384_v23 = vpack.c.bf16 %v5920_v63, %v5915_v26 }
 0x22c   : > { %4371 = vmatpush3.bf16.msra.mxu1 %v5868_v37  ;;  %v1843_v48 = vand.u32 4294901760, %v1842_v7  ;;  %v1861_v41 = vand.u32 4294901760, %v6126_v28  ;;  %v6639_v7 = vld [vmem:[#allocation19_spill] sm:$0xff] }
 0x22d   : > { %4373 = vmatprep.subr.bf16.mxu1 %v5882_v61  ;;  %v1872_v19 = vsub.f32 %v6119_v32, %v1871_v49 }
 0x22e   : > { %3838 = vmatprep.mubr.f32.mxu1 %v1843_v48  ;;  %v1862_v24 = vsub.f32 %v6126_v28, %v1861_v41  ;;  %v6640_v48 = vand.u32 4294901760, %v6639_v7  ;;  %v6652_v7 = vand.u32 4294901760, %v6016_v29 }
 0x22f   : > { %3839 = vmatmul.mubr.f32.gmra.mrb[12].mxu1 %v1853_v22  ;;  %v1873_v37 = vand.u32 4294901760, %v1872_v19  ;;  %v6641_v19 = vand.u32 4294901760, %v5975_v4 }
 0x230   : > { %4375 = vmatpush3.bf16.msra.mxu1 %v5882_v61  ;;  %v1863_v33 = vand.u32 4294901760, %v1862_v24  ;;  %v4388_v61 = vpack.c.bf16 %v5930_v14, %v5925_v34  ;;  %v6642_v24 = vand.u32 4294901760, %v5915_v26  ;;  %v6649_v26 = vand.u32 4294901760, %v6022_v38 }
 0x231   : > { %4377 = vmatprep.subr.bf16.mxu1 %v5890_v45 }
 0x232   : > { %3841 = vmatprep.mubr.f32.mxu1 %v1863_v33  ;;  %v6643_v33 = vand.u32 4294901760, %v5920_v63  ;;  %v6651_v63 = vand.u32 4294901760, %v5966_v21 }
 0x233   : > { %3842 = vmatmul.mubr.f32.gmra.mrb[14].mxu1 %v1873_v37 }
 0x234   : > { %4379 = vmatpush3.bf16.msra.mxu1 %v5890_v45  ;;  %3876 = vmatprep.mubr.f32.mxu1 %v5968_v60  ;;  %v4392_v45 = vpack.c.bf16 %v5966_v21, %v5958_v5  ;;  %v4448_v37 = vpack.c.bf16 %v6643_v33, %v6642_v24  ;;  %v6660_v21 = vld [vmem:[#allocation14_spill] sm:$0xff]  ;;  %v6662_v24 = vld [vmem:[#allocation23_spill] sm:$0xff] }
 0x235   : > { %4381 = vmatprep.subr.bf16.mxu1 %v5894_v6 }
 0x237   : > { %3877 = vmatmul.mubr.f32.vlgmr.msra.gmra.mrb[0].mxu1 %v5960_v27 }
 0x238   : > { %3879 = vmatprep.mubr.f32.mxu1 %v5983_v57  ;;  %4383 = vmatpush3.bf16.msra.mxu1 %v5894_v6  ;;  %v6634_v6 = vld [vmem:[#allocation15_spill] sm:$0xff] }
 0x239   : > { %4385 = vmatprep.subr.bf16.mxu1 %v4384_v23 }
 0x23b   : > { %3880 = vmatmul.mubr.f32.gmra.mrb[2].mxu1 %v5978_v20 }
 0x23c   : > { %3882 = vmatprep.mubr.f32.mxu1 %v6011_v17  ;;  %4387 = vmatpush3.bf16.msra.mxu1 %v4384_v23  ;;  %v6644_v23 = vand.u32 4294901760, %v5972_v10 }
 0x23d   : > { %4389 = vmatprep.subr.bf16.mxu1 %v4388_v61 }
 0x23f   : > { %3883 = vmatmul.mubr.f32.gmra.mrb[4].mxu1 %v6004_v55 }
 0x240   : > { %3885 = vmatprep.mubr.f32.mxu1 %v6031_v58  ;;  %4391 = vmatpush3.bf16.msra.mxu1 %v4388_v61  ;;  %v6645_v61 = vand.u32 4294901760, %v5996_v50 }
 0x241   : > { %4393 = vmatprep.subr.bf16.mxu1 %v4392_v45 }
 0x243   : > { %3886 = vmatmul.mubr.f32.gmra.mrb[6].mxu1 %v6027_v9 }
 0x244   : > { %3888 = vmatprep.mubr.f32.mxu1 %v6052_v46  ;;  %4395 = vmatpush3.bf16.msra.mxu1 %v4392_v45  ;;  %v6646_v45 = vand.u32 4294901760, %v5925_v34  ;;  %v6653_v34 = vand.u32 4294901760, %v6043_v25 }
 0x245   : > { %4397 = vmatprep.subr.bf16.mxu1 %v5898_v3 }
 0x247   : > { %3889 = vmatmul.mubr.f32.gmra.mrb[8].mxu1 %v6048_v12 }
 0x248   : > { %3891 = vmatprep.mubr.f32.mxu1 %v6073_v31  ;;  %4399 = vmatpush3.bf16.msra.mxu1 %v5898_v3  ;;  %v6635_v3 = vld [vmem:[#allocation12_spill] sm:$0xff] }
 0x249   : > { %4401 = vmatprep.subr.bf16.mxu1 %v5902_v53 }
 0x24b   : > { %3892 = vmatmul.mubr.f32.gmra.mrb[10].mxu1 %v6069_v0 }
 0x24c   : > { %3894 = vmatprep.mubr.f32.mxu1 %v6094_v36  ;;  %4403 = vmatpush3.bf16.msra.mxu1 %v5902_v53  ;;  %v6636_v53 = vld [vmem:[#allocation13_spill] sm:$0xff] }
 0x24d   : > { %4405 = vmatprep.subr.bf16.mxu1 %v5906_v54 }
 0x24f   : > { %3895 = vmatmul.mubr.f32.gmra.mrb[12].mxu1 %v6090_v44 }
 0x250   : > { %3897 = vmatprep.mubr.f32.mxu1 %v6114_v13  ;;  %4407 = vmatpush3.bf16.msra.mxu1 %v5906_v54  ;;  %v6637_v54 = vld [vmem:[#allocation17_spill] sm:$0xff] }
 0x251   : > { %4409 = vmatprep.subr.bf16.mxu1 %v5910_v42 }
 0x253   : > { %3898 = vmatmul.mubr.f32.gmra.mrb[14].mxu1 %v6111_v16 }
 0x254   : > { %4411 = vmatpush3.bf16.msra.mxu1 %v5910_v42  ;;  %3932 = vmatprep.mubr.f32.mxu1 %v5975_v4  ;;  %v6638_v42 = vand.u32 4294901760, %v6637_v54  ;;  %v6647_v54 = vand.u32 4294901760, %v5930_v14  ;;  %v6654_v14 = vld [vmem:[#allocation20_spill] sm:$0xff] }
 0x255   : > { %4413 = vmatprep.subr.bf16.mxu1 %v5637_v1 }
 0x256   : > { %v4444_v22 = vpack.c.bf16 %v6640_v48, %v6638_v42  ;;  %v4452_v4 = vpack.c.bf16 %v6647_v54, %v6646_v45  ;;  %v6648_v42 = vand.u32 4294901760, %v5988_v40  ;;  %v6656_v48 = vld [vmem:[#allocation22_spill] sm:$0xff] }
 0x257   : > { %3933 = vmatmul.mubr.f32.vlgmr.msra.gmra.mrb[0].mxu1 %v5972_v10  ;;  %v6650_v10 = vand.u32 4294901760, %v5958_v5  ;;  %v6659_v5 = vand.u32 4294901760, %v6064_v59 }
 0x258   : > { %3935 = vmatprep.mubr.f32.mxu1 %v5996_v50  ;;  %4415 = vmatpush3.bf16.msra.mxu1 %v5637_v1 }
 0x259   : > { %4417 = vmatprep.subr.bf16.mxu1 %v5644_v43  ;;  %v4456_v50 = vpack.c.bf16 %v6651_v63, %v6650_v10 }
 0x25b   : > { %3936 = vmatmul.mubr.f32.gmra.mrb[2].mxu1 %v5988_v40  ;;  %v6655_v40 = vand.u32 4294901760, %v6654_v14 }
 0x25c   : > { %3938 = vmatprep.mubr.f32.mxu1 %v6022_v38  ;;  %4419 = vmatpush3.bf16.msra.mxu1 %v5644_v43  ;;  %v6657_v38 = vand.u32 4294901760, %v6656_v48 }
 0x25d   : > { %4421 = vmatprep.subr.bf16.mxu1 %v5663_v11 }
 0x25f   : > { %3939 = vmatmul.mubr.f32.gmra.mrb[4].mxu1 %v6016_v29  ;;  %v6661_v29 = vand.u32 4294901760, %v6660_v21 }
 0x260   : > { %3941 = vmatprep.mubr.f32.mxu1 %v6043_v25  ;;  %4423 = vmatpush3.bf16.msra.mxu1 %v5663_v11  ;;  %v6663_v25 = vand.u32 4294901760, %v6662_v24 }
 0x261   : > { %4425 = vmatprep.subr.bf16.mxu1 %v5677_v51 }
 0x262   : > { %v4464_v33 = vpack.c.bf16 %v6663_v25, %v6661_v29 }
 0x263   : > { %3942 = vmatmul.mubr.f32.gmra.mrb[6].mxu1 %v6037_v52 }
 0x264   : > { %3944 = vmatprep.mubr.f32.mxu1 %v6064_v59  ;;  %4427 = vmatpush3.bf16.msra.mxu1 %v5677_v51 }
 0x265   : > { %4429 = vmatprep.subr.bf16.mxu1 %v5799_v56 }
 0x267   : > { %3945 = vmatmul.mubr.f32.gmra.mrb[8].mxu1 %v6057_v8 }
 0x268   : > { %3947 = vmatprep.mubr.f32.mxu1 %v6085_v2  ;;  %4431 = vmatpush3.bf16.msra.mxu1 %v5799_v56 }
 0x269   : > { %4433 = vmatprep.subr.bf16.mxu1 %v6634_v6 }
 0x26b   : > { %3948 = vmatmul.mubr.f32.gmra.mrb[10].mxu1 %v6079_v15 }
 0x26c   : > { %3950 = vmatprep.mubr.f32.mxu1 %v6106_v47  ;;  %4435 = vmatpush3.bf16.msra.mxu1 %v6634_v6 }
 0x26d   : > { %4437 = vmatprep.subr.bf16.mxu1 %v6635_v3 }
 0x26f   : > { %3951 = vmatmul.mubr.f32.gmra.mrb[12].mxu1 %v6099_v30 }
 0x270   : > { %3953 = vmatprep.mubr.f32.mxu1 %v6126_v28  ;;  %4439 = vmatpush3.bf16.msra.mxu1 %v6635_v3 }
 0x271   : > { %4441 = vmatprep.subr.bf16.mxu1 %v6636_v53 }
 0x273   : > { %3954 = vmatmul.mubr.f32.gmra.mrb[14].mxu1 %v6119_v32 }
 0x274   : > { %4443 = vmatpush3.bf16.msra.mxu1 %v6636_v53  ;;  %3988 = vmatprep.mubr.f32.mxu1 %v6641_v19  ;;  %v6658_v19 = vand.u32 4294901760, %v6037_v52  ;;  %v6665_v52 = vld [vmem:[#allocation26_spill] sm:$0xff] }
 0x275   : > { %4445 = vmatprep.subr.bf16.mxu1 %v4444_v22 }
 0x277   : > { %3989 = vmatmul.mubr.f32.vlgmr.msra.gmra.mrb[0].mxu1 %v6644_v23  ;;  %v6666_v23 = vand.u32 4294901760, %v6665_v52 }
 0x278   : > { %3991 = vmatprep.mubr.f32.mxu1 %v6645_v61  ;;  %4447 = vmatpush3.bf16.msra.mxu1 %v4444_v22  ;;  %v4460_v22 = vpack.c.bf16 %v6657_v38, %v6655_v40  ;;  %v6667_v61 = vld [vmem:[#allocation16_spill] sm:$0xff] }
 0x279   : > { %4449 = vmatprep.subr.bf16.mxu1 %v4448_v37  ;;  %v6668_v59 = vand.u32 4294901760, %v6667_v61 }
 0x27b   : > { %3992 = vmatmul.mubr.f32.gmra.mrb[2].mxu1 %v6648_v42  ;;  %v4468_v45 = vpack.c.bf16 %v6668_v59, %v6666_v23 }
 0x27c   : > { %3994 = vmatprep.mubr.f32.mxu1 %v6649_v26  ;;  %4451 = vmatpush3.bf16.msra.mxu1 %v4448_v37  ;;  %v6664_v37 = vand.u32 4294901760, %v6057_v8  ;;  %v6669_v8 = vld [vmem:[#allocation27_spill] sm:$0xff] }
 0x27d   : > { %4453 = vmatprep.subr.bf16.mxu1 %v4452_v4  ;;  %v6670_v54 = vand.u32 4294901760, %v6669_v8 }
 0x27f   : > { %3995 = vmatmul.mubr.f32.gmra.mrb[4].mxu1 %v6652_v7 }
 0x280   : > { %3997 = vmatprep.mubr.f32.mxu1 %v6653_v34  ;;  %4455 = vmatpush3.bf16.msra.mxu1 %v4452_v4  ;;  %v6671_v4 = vld [vmem:[#allocation28_spill] sm:$0xff] }
 0x281   : > { %4457 = vmatprep.subr.bf16.mxu1 %v4456_v50  ;;  %v6672_v2 = vand.u32 4294901760, %v6671_v4 }
 0x283   : > { %3998 = vmatmul.mubr.f32.gmra.mrb[6].mxu1 %v6658_v19 }
 0x284   : > { %4000 = vmatprep.mubr.f32.mxu1 %v6659_v5  ;;  %4459 = vmatpush3.bf16.msra.mxu1 %v4456_v50 }
 0x285   : > { %4461 = vmatprep.subr.bf16.mxu1 %v4460_v22 }
 0x287   : > { %4001 = vmatmul.mubr.f32.gmra.mrb[8].mxu1 %v6664_v37 }
 0x288   : > { %4003 = vmatprep.mubr.f32.mxu1 %v1821_v39  ;;  %4463 = vmatpush3.bf16.msra.mxu1 %v4460_v22  ;;  %v4472_v39 = vpack.c.bf16 %v6672_v2, %v6670_v54 }
 0x289   : > { %4465 = vmatprep.subr.bf16.mxu1 %v4464_v33 }
 0x28b   : > { %4004 = vmatmul.mubr.f32.gmra.mrb[10].mxu1 %v1831_v35 }
 0x28c   : > { %4006 = vmatprep.mubr.f32.mxu1 %v1841_v62  ;;  %4467 = vmatpush3.bf16.msra.mxu1 %v4464_v33 }
 0x28d   : > { %4469 = vmatprep.subr.bf16.mxu1 %v4468_v45 }
 0x28f   : > { %4007 = vmatmul.mubr.f32.gmra.mrb[12].mxu1 %v1851_v18 }
 0x290   : > { %4009 = vmatprep.mubr.f32.mxu1 %v1861_v41  ;;  %4471 = vmatpush3.bf16.msra.mxu1 %v4468_v45 }
 0x291   : > { %4473 = vmatprep.subr.bf16.mxu1 %v4472_v39 }
 0x293   : > { %4010 = vmatmul.mubr.f32.gmra.mrb[14].mxu1 %v1871_v49 }
 0x294   : > { %4475 = vmatpush3.bf16.msra.mxu1 %v4472_v39  ;;  %4044 = vmatprep.mubr.f32.mxu1 %v5968_v60 }
 0x295   : > { %4477 = vmatprep.subr.bf16.mxu1 %v5637_v1 }
 0x297   : > { %4045 = vmatmul.mubr.f32.vlgmr.msra.gmra.mrb[0].mxu1 %v5960_v27 }
 0x298   : > { %4047 = vmatprep.mubr.f32.mxu1 %v5983_v57  ;;  %4479 = vmatpush3.bf16.msra.mxu1 %v5637_v1  ;;  %v3060_v1 = vld [vmem:[%s6397_s4] ss:$0 sm:$0xff] }
 0x299   : > { %4481 = vmatprep.subr.bf16.mxu1 %v5644_v43 }
 0x29b   : > { %4048 = vmatmul.mubr.f32.gmra.mrb[2].mxu1 %v5978_v20 }
 0x29c   : > { %4050 = vmatprep.mubr.f32.mxu1 %v6011_v17  ;;  %4483 = vmatpush3.bf16.msra.mxu1 %v5644_v43 }
 0x29d   : > { %4485 = vmatprep.subr.bf16.mxu1 %v5663_v11 }
 0x29f   : > { %4051 = vmatmul.mubr.f32.gmra.mrb[4].mxu1 %v6004_v55 }
 0x2a0   : > { %4053 = vmatprep.mubr.f32.mxu1 %v6031_v58  ;;  %4487 = vmatpush3.bf16.msra.mxu1 %v5663_v11 }
 0x2a1   : > { %4489 = vmatprep.subr.bf16.mxu1 %v5677_v51 }
 0x2a3   : > { %4054 = vmatmul.mubr.f32.gmra.mrb[6].mxu1 %v6027_v9 }
 0x2a4   : > { %4056 = vmatprep.mubr.f32.mxu1 %v6052_v46  ;;  %4491 = vmatpush3.bf16.msra.mxu1 %v5677_v51 }
 0x2a5   : > { %4493 = vmatprep.subr.bf16.mxu1 %v5799_v56 }
 0x2a7   : > { %4057 = vmatmul.mubr.f32.gmra.mrb[8].mxu1 %v6048_v12 }
 0x2a8   : > { %4059 = vmatprep.mubr.f32.mxu1 %v6073_v31  ;;  %4495 = vmatpush3.bf16.msra.mxu1 %v5799_v56 }
 0x2a9   : > { %4497 = vmatprep.subr.bf16.mxu1 %v6634_v6 }
 0x2ab   : > { %4060 = vmatmul.mubr.f32.gmra.mrb[10].mxu1 %v6069_v0 }
 0x2ac   : > { %4062 = vmatprep.mubr.f32.mxu1 %v6094_v36  ;;  %4499 = vmatpush3.bf16.msra.mxu1 %v6634_v6 }
 0x2ad   : > { %4501 = vmatprep.subr.bf16.mxu1 %v6635_v3 }
 0x2af   : > { %4063 = vmatmul.mubr.f32.gmra.mrb[12].mxu1 %v6090_v44 }
 0x2b0   : > { %4065 = vmatprep.mubr.f32.mxu1 %v6114_v13  ;;  %4503 = vmatpush3.bf16.msra.mxu1 %v6635_v3 }
 0x2b1   : > { %4505 = vmatprep.subr.bf16.mxu1 %v6636_v53 }
 0x2b3   : > { %4066 = vmatmul.mubr.f32.gmra.mrb[14].mxu1 %v6111_v16 }
 0x2b4   : > { %4507 = vmatpush3.bf16.msra.mxu1 %v6636_v53  ;;  %4100 = vmatprep.mubr.f32.mxu1 %v5968_v60 }
 0x2b7   : > { %4101 = vmatmul.mubr.f32.vlgmr.msra.gmra.mrb[0].mxu1 %v5960_v27 }
 0x2b8   : > { %4103 = vmatprep.mubr.f32.mxu1 %v5983_v57 }
 0x2bb   : > { %4104 = vmatmul.mubr.f32.gmra.mrb[2].mxu1 %v5978_v20 }
 0x2bc   : > { %4106 = vmatprep.mubr.f32.mxu1 %v6011_v17 }
 0x2bf   : > { %4107 = vmatmul.mubr.f32.gmra.mrb[4].mxu1 %v6004_v55 }
 0x2c0   : > { %4109 = vmatprep.mubr.f32.mxu1 %v6031_v58 }
 0x2c3   : > { %4110 = vmatmul.mubr.f32.gmra.mrb[6].mxu1 %v6027_v9 }
 0x2c4   : > { %4112 = vmatprep.mubr.f32.mxu1 %v6052_v46 }
 0x2c7   : > { %4113 = vmatmul.mubr.f32.gmra.mrb[8].mxu1 %v6048_v12 }
 0x2c8   : > { %4115 = vmatprep.mubr.f32.mxu1 %v6073_v31 }
 0x2cb   : > { %4116 = vmatmul.mubr.f32.gmra.mrb[10].mxu1 %v6069_v0 }
 0x2cc   : > { %4118 = vmatprep.mubr.f32.mxu1 %v6094_v36 }
 0x2cf   : > { %4119 = vmatmul.mubr.f32.gmra.mrb[12].mxu1 %v6090_v44 }
 0x2d0   : > { %4121 = vmatprep.mubr.f32.mxu1 %v6114_v13 }
 0x2d3   : > { %4122 = vmatmul.mubr.f32.gmra.mrb[14].mxu1 %v6111_v16 }
 0x38a   : > { %v4102_v43 = vpop.f32.mrb[0].mxu1 }
 0x38b   : > { %v4524_v11 = vadd.f32 %v4102_v43, %v3060_v1  ;;  %v2830_v51 = vpop.f32.mrb[1].mxu1 }
 0x38c   : > { %v4525_v56 = vadd.f32 %v3060_v1, %v2830_v51 }
 0x38d   : > { %2925 = vst [vmem:[%s6325_s10 + $0x8] sm:$0xff] %v4524_v11 }
 0x38e   : > { %2924 = vst [vmem:[%s6325_s10] sm:$0xff] %v4525_v56  ;;  %v4105_v36 = vpop.f32.mrb[2].mxu1 }
 0x38f   : > { %v4526_v58 = vadd.f32 %v4105_v36, %v3060_v1  ;;  %v2842_v9 = vpop.f32.mrb[3].mxu1 }
 0x390   : > { %v4527_v60 = vadd.f32 %v3060_v1, %v2842_v9 }
 0x391   : > { %2927 = vst [vmem:[%s6325_s10 + $0x18] sm:$0xff] %v4526_v58 }
 0x392   : > { %2926 = vst [vmem:[%s6325_s10 + $0x10] sm:$0xff] %v4527_v60  ;;  %v4108_v27 = vpop.f32.mrb[4].mxu1 }
 0x393   : > { %v4528_v20 = vadd.f32 %v4108_v27, %v3060_v1  ;;  %v2854_v57 = vpop.f32.mrb[5].mxu1 }
 0x394   : > { %v4529_v55 = vadd.f32 %v3060_v1, %v2854_v57 }
 0x395   : > { %2929 = vst [vmem:[%s6325_s10 + $0x28] sm:$0xff] %v4528_v20 }
 0x396   : > { %2928 = vst [vmem:[%s6325_s10 + $0x20] sm:$0xff] %v4529_v55  ;;  %v4111_v17 = vpop.f32.mrb[6].mxu1 }
 0x397   : > { %v4530_v46 = vadd.f32 %v4111_v17, %v3060_v1  ;;  %v2866_v12 = vpop.f32.mrb[7].mxu1 }
 0x398   : > { %v4531_v15 = vadd.f32 %v3060_v1, %v2866_v12 }
 0x399   : > { %2931 = vst [vmem:[%s6325_s10 + $0x38] sm:$0xff] %v4530_v46 }
 0x39a   : > { %2930 = vst [vmem:[%s6325_s10 + $0x30] sm:$0xff] %v4531_v15  ;;  %v4114_v0 = vpop.f32.mrb[8].mxu1 }
 0x39b   : > { %v4532_v30 = vadd.f32 %v4114_v0, %v3060_v1  ;;  %v2878_v31 = vpop.f32.mrb[9].mxu1 }
 0x39c   : > { %v4533_v44 = vadd.f32 %v3060_v1, %v2878_v31 }
 0x39d   : > { %2933 = vst [vmem:[%s6325_s10 + $0x48] sm:$0xff] %v4532_v30 }
 0x39e   : > { %2932 = vst [vmem:[%s6325_s10 + $0x40] sm:$0xff] %v4533_v44  ;;  %v4117_v35 = vpop.f32.mrb[10].mxu1 }
 0x39f   : > { %v4534_v47 = vadd.f32 %v4117_v35, %v3060_v1  ;;  %v2890_v16 = vpop.f32.mrb[11].mxu1 }
 0x3a0   : > { %v4535_v18 = vadd.f32 %v3060_v1, %v2890_v16 }
 0x3a1   : > { %2935 = vst [vmem:[%s6325_s10 + $0x58] sm:$0xff] %v4534_v47 }
 0x3a2   : > { %2934 = vst [vmem:[%s6325_s10 + $0x50] sm:$0xff] %v4535_v18  ;;  %v4120_v13 = vpop.f32.mrb[12].mxu1 }
 0x3a3   : > { %v4536_v62 = vadd.f32 %v4120_v13, %v3060_v1  ;;  %v2902_v32 = vpop.f32.mrb[13].mxu1 }
 0x3a4   : > { %v4537_v28 = vadd.f32 %v3060_v1, %v2902_v32 }
 0x3a5   : > { %2937 = vst [vmem:[%s6325_s10 + $0x68] sm:$0xff] %v4536_v62 }
 0x3a6   : > { %2936 = vst [vmem:[%s6325_s10 + $0x60] sm:$0xff] %v4537_v28  ;;  %v4123_v49 = vpop.f32.mrb[14].mxu1 }
 0x3a7   : > { %v4538_v41 = vadd.f32 %v4123_v49, %v3060_v1  ;;  %v2914_v6 = vpop.f32.mrb[15].mxu1 }
 0x3a8   : > { %v4539_v3 = vadd.f32 %v3060_v1, %v2914_v6 }
 0x3a9   : > { %2939 = vst [vmem:[%s6325_s10 + $0x78] sm:$0xff] %v4538_v41 }
 0x3aa   : > { %2938 = vst [vmem:[%s6325_s10 + $0x70] sm:$0xff] %v4539_v3 }
 0x3ab   : > { %4870 = shalt.err (!%p4867_p7)
}
 0x3ac   : > { %s4871_s12 = scalar_lea.hbm %s6346_s11, 2048  ;;  %s4875_s15 = scalar_lea.hbm %s6398_s5, 6144 }
 0x3ad   : > { %p4872_p9 = scmp.ne.s32.totalorder %s6346_s11, %s4871_s12  ;;  %p4876_p5 = scmp.lt.u32.totalorder %s6346_s11, %s6398_s5 }
 0x3ae   : > { %p4877_p10 = scmp.lt.u32.totalorder %s4875_s15, %s4871_s12  ;;  %p4879_p2 = scmp.lt.u32.totalorder %s4871_s12, %s6346_s11 }
 0x3af   : > { %p4873_p12 = pnand %p4872_p9, %p5085_p6 }
 0x3b0   : > { %p4878_p1 = por %p4877_p10, %p4876_p5 }
 0x3b1   : > { %p4874_p0 = pneg %p4873_p12 }
 0x3b2   : > { %p4880_p4 = por %p4879_p2, %p4878_p1 }
 0x3b4   : > { %p4881_p8 = pnand %p4880_p4, %p4874_p0 }
 0x3b6   : > { %4884 = shalt.err (!%p4881_p8)
}
 0x3b7   : > { %s4935_s28 = smov 128   ;;  %s4936_s9 = smov 8  }
 0x3b8   : > { %4710 = dma.vmem_to_hbm [thread:$0]  (%p5085_p6), %s6348_s13, 2048, %s6346_s11, %s2941_s22, %s4935_s28, %s4935_s28, %s4936_s9  }
 0x3b9 PF: > { %p4732_p11 = scmp.ge.s32.totalorder %s4927_s21, 2  ;;  %s2969_s30 = sand.u32 1, %s4915_s18  }
 0x3ba   : > { %p6673_p13 = scmp.ne.s32.totalorder %s6515_s25, 0  ;;  %s2970_s17 = scalar_lea.sflag [#allocation4], %s2969_s30 }
 0x3bc   : > { %p4724_p3 = pnand %p4732_p11, %p6673_p13 }
 0x3be   : > { %4910 = dma.done.wait (!%p4724_p3), %s2970_s17, 2048  }
 0x3bf   : > { %4912 = vsyncadd (!%p4724_p3), %s2970_s17, 4294965248  ;;  %p19_p7 = scmp.ge.s32.totalorder %s5075_s29, 5   ;;  %s6674_s18 = smov %s4919_s19 }
 0x3c0   : > { %s6675_s19 = smov %s4923_s20  ;;  %s6676_s20 = smov %s5091_s27 }
 0x3c1   : > { %s6677_s21 = smov %s5075_s29  ;;  %21 = sbr.rel (!%p19_p7) target bundleno = 6 (0x6), region = 93 }
 0x3c8   :  { %2975 = vsyncpa [#allocation3], 1 }
 0x3c9   :  { %2977 = vsyncpa [#allocation3 + $0x1], 1 }
 0x3ca   :  { %2978 = vsyncpa [#allocation6], 1 }
 0x3cb   :  { %2979 = vsyncpa [#allocation4], 1 }
 0x3cc   :  { %2981 = vsyncpa [#allocation4 + $0x1], 1 }

</bundles_post_ra>
